<compile_context>
chip_gen: v6e
topology: v6e:2x2x1
jax: 0.10.0
libtpu: 0.0.40
codegen_flags: <defaults>
</compile_context>

<pallas_src>
import math

import jax
import jax.numpy as jnp
from jax.experimental import pallas as pl
from jax.experimental.pallas import tpu as pltpu


Z_DIMS = 512
N_LAYERS = 8
MIN_WIDTH = 128  # lane-pad narrow middle layers up to this width


def _layer_dims(z_dims=Z_DIMS):
    """Reproduce the channel schedule from MappingNetwork.__init__."""
    dims = []
    in_c = z_dims
    out_c = z_dims // 2
    for i in range(N_LAYERS):
        dims.append((in_c, out_c))
        in_c = out_c
        if i + 1 < 4:
            out_c //= 2
        else:
            out_c *= 2
    return dims


def mapping_kernel(x_ref, *refs):
    """Fused PixelNorm + 8x(ScaledLinear -> LeakyReLU(0.2)) for one batch tile.

    refs = (w_0..w_7, b_0..b_7, out_ref)
      w_i : (pad_in, pad_out) bf16 -- pre-transposed, equalized-lr scale folded
            in, narrow dims zero-padded to >=128 lanes
      b_i : (1, pad_out) f32       -- zero-padded to match
    """
    out_ref = refs[-1]
    w_refs = refs[0:N_LAYERS]
    b_refs = refs[N_LAYERS:2 * N_LAYERS]

    x = x_ref[...].astype(jnp.float32)

    # PixelNormalization over the feature (lane) axis.
    h = x * jax.lax.rsqrt(jnp.mean(x * x, axis=-1, keepdims=True) + 1e-8)

    # 8 equalized-lr linear layers + LeakyReLU(0.2); scale already in weights.
    for i in range(N_LAYERS):
        h = jnp.dot(h.astype(w_refs[i].dtype), w_refs[i][...],
                    preferred_element_type=jnp.float32)
        h = h + b_refs[i][...]
        h = jnp.maximum(h, 0.2 * h)  # LeakyReLU(0.2)

    out_ref[...] = h.astype(out_ref.dtype)


def mapping_network(latent_z, weights, biases, *, tb=None, out_dtype=None):
    """latent_z: (B, Z).  weights/biases: prepared via `prepare_params`
    (weights[i]: (pad_in, pad_out) bf16, biases[i]: (1, pad_out) f32)."""
    B, Z = latent_z.shape
    out_dim = weights[-1].shape[1]          # 512 (true width, never padded)
    out_dtype = latent_z.dtype if out_dtype is None else out_dtype

    # Batch tile: default 512 fits comfortably under the default scoped-VMEM
    # limit on every generation (incl. v5e's 16 MiB); multiple of 16 so bf16
    # casts of the activation fill whole packed vregs.
    if tb is None:
        tb = 512
    tb = min(tb, B)
    if tb < B:
        tb = max(16, (tb // 16) * 16)
    num_tiles = pl.cdiv(B, tb)              # ragged last tile handled by Pallas

    flops = 2 * B * sum(w.shape[0] * w.shape[1] for w in weights)
    bytes_accessed = (
        latent_z.size * latent_z.dtype.itemsize
        + sum(w.size * w.dtype.itemsize for w in weights)
        + sum(b.size * b.dtype.itemsize for b in biases)
        + B * out_dim * jnp.dtype(out_dtype).itemsize
    )

    # Activation tile marches over the batch; weights/biases stay resident
    # (constant block index -> no re-DMA across grid steps).
    in_specs = [pl.BlockSpec((tb, Z), lambda i: (i, 0))]
    in_specs += [pl.BlockSpec(w.shape, lambda i: (0, 0)) for w in weights]
    in_specs += [pl.BlockSpec(b.shape, lambda i: (0, 0)) for b in biases]

    return pl.pallas_call(
        mapping_kernel,
        grid=(num_tiles,),
        in_specs=in_specs,
        out_specs=pl.BlockSpec((tb, out_dim), lambda i: (i, 0)),
        out_shape=jax.ShapeDtypeStruct((B, out_dim), out_dtype),
        compiler_params=pltpu.CompilerParams(
            dimension_semantics=("parallel",)),
        cost_estimate=pl.CostEstimate(
            flops=flops, transcendentals=B, bytes_accessed=bytes_accessed),
    )(latent_z, *weights, *biases)


def init_params(key, z_dims=Z_DIMS):
    """Deterministic synthetic ScaledLinear params in the PyTorch layout:
    W (out_c, in_c) ~ N(0,1), bias (out_c,) (small random to exercise the
    bias-add path)."""
    dims = _layer_dims(z_dims)
    weights, biases = [], []
    for (in_c, out_c) in dims:
        key, wk, bk = jax.random.split(key, 3)
        weights.append(jax.random.normal(wk, (out_c, in_c), dtype=jnp.float32))
        biases.append(0.1 * jax.random.normal(bk, (out_c,), dtype=jnp.float32))
    return weights, biases


def prepare_params(weights, biases, min_width=MIN_WIDTH):
    """One-time host-side prep: fold sqrt(2/in_c) into W, transpose to
    (in_c, out_c), zero-pad narrow dims up to `min_width` lanes, cast weights
    to bf16 (f32 MXU accumulation in-kernel). Biases stay f32, zero-padded."""
    pw, pb = [], []
    for w, b in zip(weights, biases):
        out_c, in_c = w.shape
        scale = math.sqrt(2.0 / in_c)
        wt = (w.astype(jnp.float32) * scale).T              # (in_c, out_c)
        pin, pout = max(in_c, min_width), max(out_c, min_width)
        wt = jnp.pad(wt, ((0, pin - in_c), (0, pout - out_c)))
        bb = jnp.pad(b.astype(jnp.float32).reshape(1, -1),
                     ((0, 0), (0, pout - out_c)))
        pw.append(wt.astype(jnp.bfloat16))
        pb.append(bb)
    return pw, pb


def reference_forward(latent_z, weights, biases):
    """Plain-JAX reference on the raw (PyTorch-layout, unpadded) params,
    mirroring the kernel's bf16-weight / f32-accumulation numerics."""
    x = latent_z.astype(jnp.float32)
    h = x * jax.lax.rsqrt(jnp.mean(x * x, axis=-1, keepdims=True) + 1e-8)
    for w, b in zip(weights, biases):
        out_c, in_c = w.shape
        wt = ((w * math.sqrt(2.0 / in_c)).T).astype(jnp.bfloat16)
        h = jnp.dot(h.astype(jnp.bfloat16), wt,
                    preferred_element_type=jnp.float32)
        h = h + b.astype(jnp.float32)
        h = jnp.maximum(h, 0.2 * h)
    return h


if __name__ == "__main__":
    key = jax.random.PRNGKey(0)
    key, xk = jax.random.split(key)

    B = 32  # small batch; tb=16 exercises the batch grid (2 tiles)
    latent_z = jax.random.normal(xk, (B, Z_DIMS), dtype=jnp.float32)

    raw_w, raw_b = init_params(key, Z_DIMS)
    weights, biases = prepare_params(raw_w, raw_b)

    out = mapping_network(latent_z, weights, biases, tb=16)
    out = jax.block_until_ready(out)

    ref = reference_forward(latent_z, raw_w, raw_b)
    assert out.shape == (B, Z_DIMS), out.shape
    assert jnp.allclose(out, ref, atol=1e-2, rtol=1e-2), "mismatch vs reference"

    print("KERNEL_OK")
</pallas_src>

<mosaic_0001>
module attributes {stable_mosaic.version = 11 : i64} {
  func.func @mapping_kernel(%arg0: i32, %arg1: memref<16x512xf32, #tpu.memory_space<vmem>>, %arg2: memref<512x256xbf16, #tpu.memory_space<vmem>>, %arg3: memref<256x128xbf16, #tpu.memory_space<vmem>>, %arg4: memref<128x128xbf16, #tpu.memory_space<vmem>>, %arg5: memref<128x128xbf16, #tpu.memory_space<vmem>>, %arg6: memref<128x128xbf16, #tpu.memory_space<vmem>>, %arg7: memref<128x128xbf16, #tpu.memory_space<vmem>>, %arg8: memref<128x256xbf16, #tpu.memory_space<vmem>>, %arg9: memref<256x512xbf16, #tpu.memory_space<vmem>>, %arg10: memref<1x256xf32, #tpu.memory_space<vmem>>, %arg11: memref<1x128xf32, #tpu.memory_space<vmem>>, %arg12: memref<1x128xf32, #tpu.memory_space<vmem>>, %arg13: memref<1x128xf32, #tpu.memory_space<vmem>>, %arg14: memref<1x128xf32, #tpu.memory_space<vmem>>, %arg15: memref<1x128xf32, #tpu.memory_space<vmem>>, %arg16: memref<1x256xf32, #tpu.memory_space<vmem>>, %arg17: memref<1x512xf32, #tpu.memory_space<vmem>>, %arg18: memref<16x512xf32, #tpu.memory_space<vmem>>) attributes {dimension_semantics = [#tpu.dimension_semantics<parallel>], iteration_bounds = array<i64: 2>, scalar_prefetch = 0 : i64, scratch_operands = 0 : i64, tpu.core_type = #tpu.core_type<tc>, window_params = [{transform_indices = @transform_0, window_bounds = array<i64: 16, 512>}, {pipeline_mode = #tpu.pipeline_mode<synchronous>, transform_indices = @transform_1, window_bounds = array<i64: 512, 256>}, {pipeline_mode = #tpu.pipeline_mode<synchronous>, transform_indices = @transform_2, window_bounds = array<i64: 256, 128>}, {pipeline_mode = #tpu.pipeline_mode<synchronous>, transform_indices = @transform_3, window_bounds = array<i64: 128, 128>}, {pipeline_mode = #tpu.pipeline_mode<synchronous>, transform_indices = @transform_4, window_bounds = array<i64: 128, 128>}, {pipeline_mode = #tpu.pipeline_mode<synchronous>, transform_indices = @transform_5, window_bounds = array<i64: 128, 128>}, {pipeline_mode = #tpu.pipeline_mode<synchronous>, transform_indices = @transform_6, window_bounds = array<i64: 128, 128>}, {pipeline_mode = #tpu.pipeline_mode<synchronous>, transform_indices = @transform_7, window_bounds = array<i64: 128, 256>}, {pipeline_mode = #tpu.pipeline_mode<synchronous>, transform_indices = @transform_8, window_bounds = array<i64: 256, 512>}, {pipeline_mode = #tpu.pipeline_mode<synchronous>, transform_indices = @transform_9, window_bounds = array<i64: 1, 256>}, {pipeline_mode = #tpu.pipeline_mode<synchronous>, transform_indices = @transform_10, window_bounds = array<i64: 1, 128>}, {pipeline_mode = #tpu.pipeline_mode<synchronous>, transform_indices = @transform_11, window_bounds = array<i64: 1, 128>}, {pipeline_mode = #tpu.pipeline_mode<synchronous>, transform_indices = @transform_12, window_bounds = array<i64: 1, 128>}, {pipeline_mode = #tpu.pipeline_mode<synchronous>, transform_indices = @transform_13, window_bounds = array<i64: 1, 128>}, {pipeline_mode = #tpu.pipeline_mode<synchronous>, transform_indices = @transform_14, window_bounds = array<i64: 1, 128>}, {pipeline_mode = #tpu.pipeline_mode<synchronous>, transform_indices = @transform_15, window_bounds = array<i64: 1, 256>}, {pipeline_mode = #tpu.pipeline_mode<synchronous>, transform_indices = @transform_16, window_bounds = array<i64: 1, 512>}, {transform_indices = @transform_17, window_bounds = array<i64: 16, 512>}]} {
    %c0 = arith.constant 0 : index
    %c0_0 = arith.constant 0 : index
    %0 = vector.load %arg1[%c0, %c0_0] : memref<16x512xf32, #tpu.memory_space<vmem>>, vector<16x512xf32>
    %1 = arith.mulf %0, %0 : vector<16x512xf32>
    %cst = arith.constant dense<0.000000e+00> : vector<16xf32>
    %2 = vector.multi_reduction <add>, %1, %cst [1] : vector<16x512xf32> to vector<16xf32>
    %3 = vector.shape_cast %2 : vector<16xf32> to vector<16x1xf32>
    %cst_1 = arith.constant 5.120000e+02 : f32
    %4 = vector.broadcast %cst_1 : f32 to vector<16x1xf32>
    %5 = arith.divf %3, %4 : vector<16x1xf32>
    %cst_2 = arith.constant 9.99999993E-9 : f32
    %6 = vector.broadcast %cst_2 : f32 to vector<16x1xf32>
    %7 = arith.addf %5, %6 : vector<16x1xf32>
    %8 = math.rsqrt %7 : vector<16x1xf32>
    %9 = vector.broadcast %8 : vector<16x1xf32> to vector<16x512xf32>
    %10 = arith.mulf %0, %9 : vector<16x512xf32>
    %11 = arith.truncf %10 : vector<16x512xf32> to vector<16x512xbf16>
    %c0_3 = arith.constant 0 : index
    %c0_4 = arith.constant 0 : index
    %12 = vector.load %arg2[%c0_3, %c0_4] : memref<512x256xbf16, #tpu.memory_space<vmem>>, vector<512x256xbf16>
    %cst_5 = arith.constant dense<0.000000e+00> : vector<16x256xf32>
    %13 = tpu.matmul %11, %12, %cst_5 {dimension_numbers = #tpu.dot_dimension_numbers<[1], [0], [0], [1], [0, 0, 1, 1], [], []>} : vector<16x512xbf16>, vector<512x256xbf16>, vector<16x256xf32> -> vector<16x256xf32>
    %c0_6 = arith.constant 0 : index
    %c0_7 = arith.constant 0 : index
    %14 = vector.load %arg10[%c0_6, %c0_7] : memref<1x256xf32, #tpu.memory_space<vmem>>, vector<1x256xf32>
    %15 = vector.broadcast %14 : vector<1x256xf32> to vector<16x256xf32>
    %16 = arith.addf %13, %15 : vector<16x256xf32>
    %cst_8 = arith.constant 2.000000e-01 : f32
    %17 = vector.broadcast %cst_8 : f32 to vector<16x256xf32>
    %18 = arith.mulf %17, %16 : vector<16x256xf32>
    %19 = arith.maximumf %16, %18 : vector<16x256xf32>
    %20 = arith.truncf %19 : vector<16x256xf32> to vector<16x256xbf16>
    %c0_9 = arith.constant 0 : index
    %c0_10 = arith.constant 0 : index
    %21 = vector.load %arg3[%c0_9, %c0_10] : memref<256x128xbf16, #tpu.memory_space<vmem>>, vector<256x128xbf16>
    %cst_11 = arith.constant dense<0.000000e+00> : vector<16x128xf32>
    %22 = tpu.matmul %20, %21, %cst_11 {dimension_numbers = #tpu.dot_dimension_numbers<[1], [0], [0], [1], [0, 0, 1, 1], [], []>} : vector<16x256xbf16>, vector<256x128xbf16>, vector<16x128xf32> -> vector<16x128xf32>
    %c0_12 = arith.constant 0 : index
    %c0_13 = arith.constant 0 : index
    %23 = vector.load %arg11[%c0_12, %c0_13] : memref<1x128xf32, #tpu.memory_space<vmem>>, vector<1x128xf32>
    %24 = vector.broadcast %23 : vector<1x128xf32> to vector<16x128xf32>
    %25 = arith.addf %22, %24 : vector<16x128xf32>
    %cst_14 = arith.constant 2.000000e-01 : f32
    %26 = vector.broadcast %cst_14 : f32 to vector<16x128xf32>
    %27 = arith.mulf %26, %25 : vector<16x128xf32>
    %28 = arith.maximumf %25, %27 : vector<16x128xf32>
    %29 = arith.truncf %28 : vector<16x128xf32> to vector<16x128xbf16>
    %c0_15 = arith.constant 0 : index
    %c0_16 = arith.constant 0 : index
    %30 = vector.load %arg4[%c0_15, %c0_16] : memref<128x128xbf16, #tpu.memory_space<vmem>>, vector<128x128xbf16>
    %cst_17 = arith.constant dense<0.000000e+00> : vector<16x128xf32>
    %31 = tpu.matmul %29, %30, %cst_17 {dimension_numbers = #tpu.dot_dimension_numbers<[1], [0], [0], [1], [0, 0, 1, 1], [], []>} : vector<16x128xbf16>, vector<128x128xbf16>, vector<16x128xf32> -> vector<16x128xf32>
    %c0_18 = arith.constant 0 : index
    %c0_19 = arith.constant 0 : index
    %32 = vector.load %arg12[%c0_18, %c0_19] : memref<1x128xf32, #tpu.memory_space<vmem>>, vector<1x128xf32>
    %33 = vector.broadcast %32 : vector<1x128xf32> to vector<16x128xf32>
    %34 = arith.addf %31, %33 : vector<16x128xf32>
    %cst_20 = arith.constant 2.000000e-01 : f32
    %35 = vector.broadcast %cst_20 : f32 to vector<16x128xf32>
    %36 = arith.mulf %35, %34 : vector<16x128xf32>
    %37 = arith.maximumf %34, %36 : vector<16x128xf32>
    %38 = arith.truncf %37 : vector<16x128xf32> to vector<16x128xbf16>
    %c0_21 = arith.constant 0 : index
    %c0_22 = arith.constant 0 : index
    %39 = vector.load %arg5[%c0_21, %c0_22] : memref<128x128xbf16, #tpu.memory_space<vmem>>, vector<128x128xbf16>
    %cst_23 = arith.constant dense<0.000000e+00> : vector<16x128xf32>
    %40 = tpu.matmul %38, %39, %cst_23 {dimension_numbers = #tpu.dot_dimension_numbers<[1], [0], [0], [1], [0, 0, 1, 1], [], []>} : vector<16x128xbf16>, vector<128x128xbf16>, vector<16x128xf32> -> vector<16x128xf32>
    %c0_24 = arith.constant 0 : index
    %c0_25 = arith.constant 0 : index
    %41 = vector.load %arg13[%c0_24, %c0_25] : memref<1x128xf32, #tpu.memory_space<vmem>>, vector<1x128xf32>
    %42 = vector.broadcast %41 : vector<1x128xf32> to vector<16x128xf32>
    %43 = arith.addf %40, %42 : vector<16x128xf32>
    %cst_26 = arith.constant 2.000000e-01 : f32
    %44 = vector.broadcast %cst_26 : f32 to vector<16x128xf32>
    %45 = arith.mulf %44, %43 : vector<16x128xf32>
    %46 = arith.maximumf %43, %45 : vector<16x128xf32>
    %47 = arith.truncf %46 : vector<16x128xf32> to vector<16x128xbf16>
    %c0_27 = arith.constant 0 : index
    %c0_28 = arith.constant 0 : index
    %48 = vector.load %arg6[%c0_27, %c0_28] : memref<128x128xbf16, #tpu.memory_space<vmem>>, vector<128x128xbf16>
    %cst_29 = arith.constant dense<0.000000e+00> : vector<16x128xf32>
    %49 = tpu.matmul %47, %48, %cst_29 {dimension_numbers = #tpu.dot_dimension_numbers<[1], [0], [0], [1], [0, 0, 1, 1], [], []>} : vector<16x128xbf16>, vector<128x128xbf16>, vector<16x128xf32> -> vector<16x128xf32>
    %c0_30 = arith.constant 0 : index
    %c0_31 = arith.constant 0 : index
    %50 = vector.load %arg14[%c0_30, %c0_31] : memref<1x128xf32, #tpu.memory_space<vmem>>, vector<1x128xf32>
    %51 = vector.broadcast %50 : vector<1x128xf32> to vector<16x128xf32>
    %52 = arith.addf %49, %51 : vector<16x128xf32>
    %cst_32 = arith.constant 2.000000e-01 : f32
    %53 = vector.broadcast %cst_32 : f32 to vector<16x128xf32>
    %54 = arith.mulf %53, %52 : vector<16x128xf32>
    %55 = arith.maximumf %52, %54 : vector<16x128xf32>
    %56 = arith.truncf %55 : vector<16x128xf32> to vector<16x128xbf16>
    %c0_33 = arith.constant 0 : index
    %c0_34 = arith.constant 0 : index
    %57 = vector.load %arg7[%c0_33, %c0_34] : memref<128x128xbf16, #tpu.memory_space<vmem>>, vector<128x128xbf16>
    %cst_35 = arith.constant dense<0.000000e+00> : vector<16x128xf32>
    %58 = tpu.matmul %56, %57, %cst_35 {dimension_numbers = #tpu.dot_dimension_numbers<[1], [0], [0], [1], [0, 0, 1, 1], [], []>} : vector<16x128xbf16>, vector<128x128xbf16>, vector<16x128xf32> -> vector<16x128xf32>
    %c0_36 = arith.constant 0 : index
    %c0_37 = arith.constant 0 : index
    %59 = vector.load %arg15[%c0_36, %c0_37] : memref<1x128xf32, #tpu.memory_space<vmem>>, vector<1x128xf32>
    %60 = vector.broadcast %59 : vector<1x128xf32> to vector<16x128xf32>
    %61 = arith.addf %58, %60 : vector<16x128xf32>
    %cst_38 = arith.constant 2.000000e-01 : f32
    %62 = vector.broadcast %cst_38 : f32 to vector<16x128xf32>
    %63 = arith.mulf %62, %61 : vector<16x128xf32>
    %64 = arith.maximumf %61, %63 : vector<16x128xf32>
    %65 = arith.truncf %64 : vector<16x128xf32> to vector<16x128xbf16>
    %c0_39 = arith.constant 0 : index
    %c0_40 = arith.constant 0 : index
    %66 = vector.load %arg8[%c0_39, %c0_40] : memref<128x256xbf16, #tpu.memory_space<vmem>>, vector<128x256xbf16>
    %cst_41 = arith.constant dense<0.000000e+00> : vector<16x256xf32>
    %67 = tpu.matmul %65, %66, %cst_41 {dimension_numbers = #tpu.dot_dimension_numbers<[1], [0], [0], [1], [0, 0, 1, 1], [], []>} : vector<16x128xbf16>, vector<128x256xbf16>, vector<16x256xf32> -> vector<16x256xf32>
    %c0_42 = arith.constant 0 : index
    %c0_43 = arith.constant 0 : index
    %68 = vector.load %arg16[%c0_42, %c0_43] : memref<1x256xf32, #tpu.memory_space<vmem>>, vector<1x256xf32>
    %69 = vector.broadcast %68 : vector<1x256xf32> to vector<16x256xf32>
    %70 = arith.addf %67, %69 : vector<16x256xf32>
    %cst_44 = arith.constant 2.000000e-01 : f32
    %71 = vector.broadcast %cst_44 : f32 to vector<16x256xf32>
    %72 = arith.mulf %71, %70 : vector<16x256xf32>
    %73 = arith.maximumf %70, %72 : vector<16x256xf32>
    %74 = arith.truncf %73 : vector<16x256xf32> to vector<16x256xbf16>
    %c0_45 = arith.constant 0 : index
    %c0_46 = arith.constant 0 : index
    %75 = vector.load %arg9[%c0_45, %c0_46] : memref<256x512xbf16, #tpu.memory_space<vmem>>, vector<256x512xbf16>
    %cst_47 = arith.constant dense<0.000000e+00> : vector<16x512xf32>
    %76 = tpu.matmul %74, %75, %cst_47 {dimension_numbers = #tpu.dot_dimension_numbers<[1], [0], [0], [1], [0, 0, 1, 1], [], []>} : vector<16x256xbf16>, vector<256x512xbf16>, vector<16x512xf32> -> vector<16x512xf32>
    %c0_48 = arith.constant 0 : index
    %c0_49 = arith.constant 0 : index
    %77 = vector.load %arg17[%c0_48, %c0_49] : memref<1x512xf32, #tpu.memory_space<vmem>>, vector<1x512xf32>
    %78 = vector.broadcast %77 : vector<1x512xf32> to vector<16x512xf32>
    %79 = arith.addf %76, %78 : vector<16x512xf32>
    %cst_50 = arith.constant 2.000000e-01 : f32
    %80 = vector.broadcast %cst_50 : f32 to vector<16x512xf32>
    %81 = arith.mulf %80, %79 : vector<16x512xf32>
    %82 = arith.maximumf %79, %81 : vector<16x512xf32>
    %c0_51 = arith.constant 0 : index
    %c0_52 = arith.constant 0 : index
    %83 = vector.load %arg18[%c0_51, %c0_52] : memref<16x512xf32, #tpu.memory_space<vmem>>, vector<16x512xf32>
    tpu.vector_store %arg18[%c0_51, %c0_52], %82 {strides = array<i32>} : memref<16x512xf32, #tpu.memory_space<vmem>>, vector<16x512xf32>,
    return
  }
  func.func @transform_0(%arg0: i32) -> (i32, i32) {
    %c0_i32 = arith.constant 0 : i32
    %c0_i32_0 = arith.constant 0 : i32
    return %arg0, %c0_i32 : i32, i32
  }
  func.func @transform_1(%arg0: i32) -> (i32, i32) {
    %c0_i32 = arith.constant 0 : i32
    %c0_i32_0 = arith.constant 0 : i32
    %c0_i32_1 = arith.constant 0 : i32
    return %c0_i32, %c0_i32_0 : i32, i32
  }
  func.func @transform_2(%arg0: i32) -> (i32, i32) {
    %c0_i32 = arith.constant 0 : i32
    %c0_i32_0 = arith.constant 0 : i32
    %c0_i32_1 = arith.constant 0 : i32
    return %c0_i32, %c0_i32_0 : i32, i32
  }
  func.func @transform_3(%arg0: i32) -> (i32, i32) {
    %c0_i32 = arith.constant 0 : i32
    %c0_i32_0 = arith.constant 0 : i32
    %c0_i32_1 = arith.constant 0 : i32
    return %c0_i32, %c0_i32_0 : i32, i32
  }
  func.func @transform_4(%arg0: i32) -> (i32, i32) {
    %c0_i32 = arith.constant 0 : i32
    %c0_i32_0 = arith.constant 0 : i32
    %c0_i32_1 = arith.constant 0 : i32
    return %c0_i32, %c0_i32_0 : i32, i32
  }
  func.func @transform_5(%arg0: i32) -> (i32, i32) {
    %c0_i32 = arith.constant 0 : i32
    %c0_i32_0 = arith.constant 0 : i32
    %c0_i32_1 = arith.constant 0 : i32
    return %c0_i32, %c0_i32_0 : i32, i32
  }
  func.func @transform_6(%arg0: i32) -> (i32, i32) {
    %c0_i32 = arith.constant 0 : i32
    %c0_i32_0 = arith.constant 0 : i32
    %c0_i32_1 = arith.constant 0 : i32
    return %c0_i32, %c0_i32_0 : i32, i32
  }
  func.func @transform_7(%arg0: i32) -> (i32, i32) {
    %c0_i32 = arith.constant 0 : i32
    %c0_i32_0 = arith.constant 0 : i32
    %c0_i32_1 = arith.constant 0 : i32
    return %c0_i32, %c0_i32_0 : i32, i32
  }
  func.func @transform_8(%arg0: i32) -> (i32, i32) {
    %c0_i32 = arith.constant 0 : i32
    %c0_i32_0 = arith.constant 0 : i32
    %c0_i32_1 = arith.constant 0 : i32
    return %c0_i32, %c0_i32_0 : i32, i32
  }
  func.func @transform_9(%arg0: i32) -> (i32, i32) {
    %c0_i32 = arith.constant 0 : i32
    %c0_i32_0 = arith.constant 0 : i32
    %c0_i32_1 = arith.constant 0 : i32
    return %c0_i32, %c0_i32_0 : i32, i32
  }
  func.func @transform_10(%arg0: i32) -> (i32, i32) {
    %c0_i32 = arith.constant 0 : i32
    %c0_i32_0 = arith.constant 0 : i32
    %c0_i32_1 = arith.constant 0 : i32
    return %c0_i32, %c0_i32_0 : i32, i32
  }
  func.func @transform_11(%arg0: i32) -> (i32, i32) {
    %c0_i32 = arith.constant 0 : i32
    %c0_i32_0 = arith.constant 0 : i32
    %c0_i32_1 = arith.constant 0 : i32
    return %c0_i32, %c0_i32_0 : i32, i32
  }
  func.func @transform_12(%arg0: i32) -> (i32, i32) {
    %c0_i32 = arith.constant 0 : i32
    %c0_i32_0 = arith.constant 0 : i32
    %c0_i32_1 = arith.constant 0 : i32
    return %c0_i32, %c0_i32_0 : i32, i32
  }
  func.func @transform_13(%arg0: i32) -> (i32, i32) {
    %c0_i32 = arith.constant 0 : i32
    %c0_i32_0 = arith.constant 0 : i32
    %c0_i32_1 = arith.constant 0 : i32
    return %c0_i32, %c0_i32_0 : i32, i32
  }
  func.func @transform_14(%arg0: i32) -> (i32, i32) {
    %c0_i32 = arith.constant 0 : i32
    %c0_i32_0 = arith.constant 0 : i32
    %c0_i32_1 = arith.constant 0 : i32
    return %c0_i32, %c0_i32_0 : i32, i32
  }
  func.func @transform_15(%arg0: i32) -> (i32, i32) {
    %c0_i32 = arith.constant 0 : i32
    %c0_i32_0 = arith.constant 0 : i32
    %c0_i32_1 = arith.constant 0 : i32
    return %c0_i32, %c0_i32_0 : i32, i32
  }
  func.func @transform_16(%arg0: i32) -> (i32, i32) {
    %c0_i32 = arith.constant 0 : i32
    %c0_i32_0 = arith.constant 0 : i32
    %c0_i32_1 = arith.constant 0 : i32
    return %c0_i32, %c0_i32_0 : i32, i32
  }
  func.func @transform_17(%arg0: i32) -> (i32, i32) {
    %c0_i32 = arith.constant 0 : i32
    %c0_i32_0 = arith.constant 0 : i32
    return %arg0, %c0_i32 : i32, i32
  }
}

</mosaic_0001>

<bundles_post_ra>
// kernel: tpu_custom_call.1
= control target key start
LH: loop header
LB: loop body
LE: loop exit
PB: predicated region body
PF: predicated region fallthrough
CT: control target
= control target key end

     0   :  { %s4327_s0 = inlined_call_operand.hbm [shape: f32[32,512], index: 0, kind: input, shape index: {}]   ;;  %s4328_s1 = inlined_call_operand.hbm [shape: bf16[512,256], index: 1, kind: input, shape index: {}]   ;;  %s4329_s2 = inlined_call_operand.hbm [shape: bf16[256,128], index: 2, kind: input, shape index: {}]   ;;  %s4330_s3 = inlined_call_operand.hbm [shape: bf16[128,128], index: 3, kind: input, shape index: {}]   ;;  %s4331_s4 = inlined_call_operand.hbm [shape: bf16[128,128], index: 4, kind: input, shape index: {}]   ;;  %s4332_s5 = inlined_call_operand.hbm [shape: bf16[128,128], index: 5, kind: input, shape index: {}]   ;;  %s4333_s6 = inlined_call_operand.hbm [shape: bf16[128,128], index: 6, kind: input, shape index: {}]   ;;  %s4334_s7 = inlined_call_operand.hbm [shape: bf16[128,256], index: 7, kind: input, shape index: {}]   ;;  %s4335_s8 = inlined_call_operand.hbm [shape: bf16[256,512], index: 8, kind: input, shape index: {}]   ;;  %s4336_s9 = inlined_call_operand.vmem [shape: f32[1,256], index: 9, kind: input, shape index: {}]   ;;  %s4337_s10 = inlined_call_operand.vmem [shape: f32[1,128], index: 10, kind: input, shape index: {}]   ;;  %s4338_s11 = inlined_call_operand.vmem [shape: f32[1,128], index: 11, kind: input, shape index: {}]   ;;  %s4339_s12 = inlined_call_operand.vmem [shape: f32[1,128], index: 12, kind: input, shape index: {}]   ;;  %s4340_s13 = inlined_call_operand.vmem [shape: f32[1,128], index: 13, kind: input, shape index: {}]   ;;  %s4341_s14 = inlined_call_operand.vmem [shape: f32[1,128], index: 14, kind: input, shape index: {}]   ;;  %s4342_s15 = inlined_call_operand.vmem [shape: f32[1,256], index: 15, kind: input, shape index: {}]   ;;  %s4343_s16 = inlined_call_operand.vmem [shape: f32[1,512], index: 16, kind: input, shape index: {}]   ;;  %s4344_s17 = inlined_call_operand.hbm [shape: f32[32,512], index: 17, kind: output, shape index: {}]  }
   0x1   :  { %4353 = sst [smem:[#allocation24_spill]] %s4327_s0 }
   0x2   :  { %4354 = sst [smem:[#allocation25_spill]] %s4328_s1 }
   0x3   :  { %4355 = sst [smem:[#allocation26_spill]] %s4329_s2 }
   0x4   :  { %4356 = sst [smem:[#allocation27_spill]] %s4330_s3 }
   0x5   :  { %4357 = sst [smem:[#allocation28_spill]] %s4331_s4 }
   0x6   :  { %4358 = sst [smem:[#allocation29_spill]] %s4332_s5 }
   0x7   :  { %4359 = sst [smem:[#allocation30_spill]] %s4333_s6 }
   0x8   :  { %4360 = sst [smem:[#allocation31_spill]] %s4334_s7 }
   0x9   :  { %4361 = sst [smem:[#allocation32_spill]] %s4341_s14 }
   0xa   :  { %4362 = sst [smem:[#allocation33_spill]] %s4342_s15 }
   0xb   :  { %4363 = sst [smem:[#allocation34_spill]] %s4343_s16 }
   0xc   :  { %4364 = sst [smem:[#allocation35_spill]] %s4344_s17 }
   0xd   :  { %22 = vsyncpa [#allocation3], 0 }
   0xe   :  { %24 = vsyncpa [#allocation3 + $0x1], 0 }
   0xf   :  { %25 = vsyncpa [#allocation6], 0 }
  0x10   :  { %26 = vsyncpa [#allocation9], 0 }
  0x11   :  { %27 = vsyncpa [#allocation12], 0 }
  0x12   :  { %28 = vsyncpa [#allocation15], 0 }
  0x13   :  { %29 = vsyncpa [#allocation4], 0 }
  0x14   :  { %31 = vsyncpa [#allocation4 + $0x1], 0  ;;  %s3924_s24 = smov 0   ;;  %s3926_s25 = smov 0  }
  0x15   :  { %s3928_s26 = smov 0   ;;  %s3930_s27 = smov 0  }
  0x16 LB: > { %s3811_s28 = smov [#allocation5]   ;;  %s3945_s0 = sadd.s32 4294967295, %s3809_s27   ;;  %s3809_s27 = sphi %s3930_s27, %s4403_s27   ;;  %s3805_s26 = sphi %s3928_s26, %s4402_s26   ;;  %s3801_s25 = sphi %s3926_s25, %s4401_s25   ;;  %s3797_s24 = sphi %s3924_s24, %s4400_s24  }
  0x17   : > { %s442_s29 = sshll.u32 %s3811_s28, 4  ;;  %p2715_p0 = scmp.ge.s32.totalorder %s3809_s27, 1  ;;  %s443_s29 = int_to_ptr.vmem [resolvable:$true] %s442_s29 }
  0x18   : > { %p4349_p1 = scmp.eq.s32.totalorder %s3945_s0, 0  ;;  %p430_p2 = scmp.lt.s32.totalorder %s3809_s27, 3 }
  0x19   : > { %s3812_s19 = smov [#allocation8]   ;;  %s3813_s20 = smov [#allocation11]  }
  0x1a   : > { %p3950_p3 = pnand %p2715_p0, %p430_p2  ;;  %s468_s1 = sshll.u32 %s3812_s19, 4  ;;  %s3963_s1 = int_to_ptr.vmem [resolvable:$true] %s468_s1 }
  0x1b   : > { %s3965_s21 = sshll.u32 %s3813_s20, 4  ;;  %s3504_s23 = scalar_lea.vmem %s443_s29, 8192  ;;  %s495_s21 = int_to_ptr.vmem [resolvable:$true] %s3965_s21 }
  0x1c   : > { %s4365_s30 = scalar_select %p3950_p3, 1, 0 }
  0x1d   : > { %p3121_p5 = pneg %p3950_p3  ;;  %p3505_p8 = scmp.ne.s32.totalorder %s443_s29, %s3504_s23 }
  0x1e   : > { %p3512_p11 = scmp.lt.s32.totalorder %s443_s29, %s443_s29  ;;  %p3513_p12 = scmp.lt.s32.totalorder %s3504_s23, %s3504_s23 }
  0x1f   : > { %p3959_p6 = pnand %p3121_p5, %p4349_p1 }
  0x20   : > { %p3514_p13 = por %p3513_p12, %p3512_p11 }
  0x21   : > { %p3969_p7 = pneg %p3959_p6 }
  0x23   : > { %p3507_p9 = pnand %p3505_p8, %p3969_p7 }
  0x25   : > { %p3508_p10 = pneg %p3507_p9 }
  0x27   : > { %p3515_p0 = pnand %p3514_p13, %p3508_p10 }
  0x29   : > { %3518 = shalt.err (!%p3515_p0)
}
  0x2a   : > { %s4347_s28 = smov 128   ;;  %s4348_s19 = smov 8  }
  0x2b   : > { %s4368_s16 = sld [smem:[#allocation25_spill]]  ;;  %s3530_s15 = scalar_lea.vmem %s3963_s1, 1024 }
  0x2c   : > { %p3531_p2 = scmp.ne.s32.totalorder %s3963_s1, %s3530_s15  ;;  %p3538_p9 = scmp.lt.s32.totalorder %s3963_s1, %s3963_s1 }
  0x2d   : > { %p3539_p10 = scmp.lt.s32.totalorder %s3530_s15, %s3530_s15 }
  0x2e   : > { %p3533_p5 = pnand %p3531_p2, %p3969_p7 }
  0x2f   : > { %p3540_p11 = por %p3539_p10, %p3538_p9 }
  0x30   : > { %p3534_p8 = pneg %p3533_p5 }
  0x31   : > { %3124 = dma.hbm_to_vmem [thread:$0]  (!%p3959_p6), %s4368_s16, 8192, %s443_s29, [#allocation6], %s4347_s28, %s4347_s28, %s4348_s19  }
  0x32   : > { %p3541_p12 = pnand %p3540_p11, %p3534_p8 }
  0x34   : > { %3544 = shalt.err (!%p3541_p12)
}
  0x35   : > { %s3816_s23 = smov 64   ;;  %s3817_s14 = smov 4  }
  0x36   : > { %s4369_s3 = sld [smem:[#allocation27_spill]]  ;;  %s3556_s29 = scalar_lea.vmem %s495_s21, 1024 }
  0x37   : > { %p3557_p13 = scmp.ne.s32.totalorder %s495_s21, %s3556_s29  ;;  %p3564_p5 = scmp.lt.s32.totalorder %s495_s21, %s495_s21 }
  0x38   : > { %p3565_p8 = scmp.lt.s32.totalorder %s3556_s29, %s3556_s29 }
  0x39   : > { %p3559_p0 = pnand %p3557_p13, %p3969_p7 }
  0x3a   : > { %p3566_p9 = por %p3565_p8, %p3564_p5 }
  0x3b   : > { %p3560_p2 = pneg %p3559_p0 }
  0x3c   : > { %3130 = dma.hbm_to_vmem [thread:$0]  (!%p3959_p6), %s4369_s3, 1024, %s3963_s1, [#allocation9], %s3816_s23, %s3816_s23, %s3817_s14  }
  0x3d   : > { %p3567_p10 = pnand %p3566_p9, %p3560_p2 }
  0x3f   : > { %3570 = shalt.err (!%p3567_p10)
}
  0x40   : > { %s4370_s5 = sld [smem:[#allocation29_spill]]  ;;  %s3818_s1 = smov [#allocation14]  }
  0x41   : > { %s520_s16 = sshll.u32 %s3818_s1, 4  ;;  %s3819_s17 = smov [#allocation7]   ;;  %s521_s16 = int_to_ptr.vmem [resolvable:$true] %s520_s16 }
  0x42   : > { %s455_s28 = sshll.u32 %s3819_s17, 4  ;;  %s3582_s19 = scalar_lea.vmem %s521_s16, 2048  ;;  %s456_s28 = int_to_ptr.vmem [resolvable:$true] %s455_s28 }
  0x43   : > { %p3583_p11 = scmp.ne.s32.totalorder %s521_s16, %s3582_s19  ;;  %p3590_p0 = scmp.lt.s32.totalorder %s521_s16, %s521_s16 }
  0x44   : > { %p3591_p2 = scmp.lt.s32.totalorder %s3582_s19, %s3582_s19 }
  0x45   : > { %p3585_p12 = pnand %p3583_p11, %p3969_p7 }
  0x46   : > { %3136 = dma.hbm_to_vmem [thread:$0]  (!%p3959_p6), %s4370_s5, 1024, %s495_s21, [#allocation12], %s3816_s23, %s3816_s23, %s3817_s14  }
  0x47   : > { %p3586_p13 = pneg %p3585_p12  ;;  %p3592_p5 = por %p3591_p2, %p3590_p0 }
  0x49   : > { %p3593_p8 = pnand %p3592_p5, %p3586_p13 }
  0x4b   : > { %3596 = shalt.err (!%p3593_p8)
}
  0x4c   : > { %s4371_s29 = smov 8   ;;  %s4372_s15 = smov 128  }
  0x4d   : > { %s4373_s7 = sld [smem:[#allocation31_spill]]  ;;  %s3608_s1 = scalar_lea.vmem %s456_s28, 2048 }
  0x4e   : > { %p3609_p9 = scmp.ne.s32.totalorder %s456_s28, %s3608_s1  ;;  %p3616_p12 = scmp.lt.s32.totalorder %s456_s28, %s456_s28 }
  0x4f   : > { %p3617_p0 = scmp.lt.s32.totalorder %s3608_s1, %s3608_s1 }
  0x50   : > { %p3611_p10 = pnand %p3609_p9, %p3969_p7 }
  0x51   : > { %p3618_p13 = por %p3617_p0, %p3616_p12 }
  0x52   : > { %p3612_p11 = pneg %p3611_p10 }
  0x53   : > { %3142 = dma.hbm_to_vmem [thread:$0]  (!%p3959_p6), %s4373_s7, 2048, %s521_s16, [#allocation15], %s4372_s15, %s4372_s15, %s4371_s29  }
  0x54   : > { %p3619_p2 = pnand %p3618_p13, %p3612_p11 }
  0x56   : > { %3622 = shalt.err (!%p3619_p2)
}
  0x57   : > { %s4374_s2 = sld [smem:[#allocation26_spill]]  ;;  %s3820_s16 = smov [#allocation10]  }
  0x58   : > { %s481_s29 = sshll.u32 %s3820_s16, 4  ;;  %s3821_s15 = smov [#allocation13]   ;;  %s482_s29 = int_to_ptr.vmem [resolvable:$true] %s481_s29 }
  0x59   : > { %s507_s21 = sshll.u32 %s3821_s15, 4  ;;  %s3634_s20 = scalar_lea.vmem %s482_s29, 1024  ;;  %s508_s21 = int_to_ptr.vmem [resolvable:$true] %s507_s21 }
  0x5a   : > { %p3635_p5 = scmp.ne.s32.totalorder %s482_s29, %s3634_s20  ;;  %p3642_p10 = scmp.lt.s32.totalorder %s482_s29, %s482_s29 }
  0x5b   : > { %p3643_p11 = scmp.lt.s32.totalorder %s3634_s20, %s3634_s20 }
  0x5c   : > { %p3637_p8 = pnand %p3635_p5, %p3969_p7 }
  0x5d   : > { %3127 = dma.hbm_to_vmem [thread:$0]  (!%p3959_p6), %s4374_s2, 2048, %s456_s28, [#allocation6], %s3816_s23, %s3816_s23, %s3817_s14  }
  0x5e   : > { %p3638_p9 = pneg %p3637_p8  ;;  %p3644_p12 = por %p3643_p11, %p3642_p10 }
  0x60   : > { %p3645_p0 = pnand %p3644_p12, %p3638_p9 }
  0x62   : > { %3648 = shalt.err (!%p3645_p0)
}
  0x63   : > { %s4375_s4 = sld [smem:[#allocation28_spill]]  ;;  %s3660_s19 = scalar_lea.vmem %s508_s21, 1024 }
  0x64   : > { %p3661_p13 = scmp.ne.s32.totalorder %s508_s21, %s3660_s19  ;;  %p3668_p8 = scmp.lt.s32.totalorder %s508_s21, %s508_s21 }
  0x65   : > { %p3669_p10 = scmp.lt.s32.totalorder %s3660_s19, %s3660_s19 }
  0x66   : > { %p3663_p2 = pnand %p3661_p13, %p3969_p7 }
  0x67   : > { %p3670_p9 = por %p3669_p10, %p3668_p8 }
  0x68   : > { %p3664_p5 = pneg %p3663_p2 }
  0x69   : > { %3133 = dma.hbm_to_vmem [thread:$0]  (!%p3959_p6), %s4375_s4, 1024, %s482_s29, [#allocation9], %s3816_s23, %s3816_s23, %s3817_s14  }
  0x6a   : > { %p3671_p11 = pnand %p3670_p9, %p3664_p5 }
  0x6c   : > { %3674 = shalt.err (!%p3671_p11)
}
  0x6d   : > { %s4376_s6 = sld [smem:[#allocation30_spill]]  ;;  %s3822_s29 = smov [#allocation16]  }
  0x6e   : > { %s533_s15 = sshll.u32 %s3822_s29, 4  ;;  %s534_s15 = int_to_ptr.vmem [resolvable:$true] %s533_s15 }
  0x6f   : > { %s3686_s20 = scalar_lea.vmem %s534_s15, 8192  ;;  %p3694_p2 = scmp.lt.s32.totalorder %s534_s15, %s534_s15 }
  0x70   : > { %p3687_p12 = scmp.ne.s32.totalorder %s534_s15, %s3686_s20  ;;  %p3695_p5 = scmp.lt.s32.totalorder %s3686_s20, %s3686_s20 }
  0x72   : > { %p3689_p0 = pnand %p3687_p12, %p3969_p7  ;;  %p3696_p8 = por %p3695_p5, %p3694_p2 }
  0x73   : > { %3139 = dma.hbm_to_vmem [thread:$0]  (!%p3959_p6), %s4376_s6, 1024, %s508_s21, [#allocation12], %s3816_s23, %s3816_s23, %s3817_s14  }
  0x74   : > { %p3690_p13 = pneg %p3689_p0 }
  0x76   : > { %p3697_p10 = pnand %p3696_p8, %p3690_p13 }
  0x78   : > { %3700 = shalt.err (!%p3697_p10)
}
  0x79   : > { %s3823_s28 = smov 256   ;;  %s3824_s14 = smov 16  }
  0x7a   : > { %3145 = dma.hbm_to_vmem [thread:$0]  (!%p3959_p6), %s4335_s8, 8192, %s534_s15, [#allocation15], %s3823_s28, %s3823_s28, %s3824_s14  }
  0x7b   : > { %s2714_s21 = sadd.s32 4294967294, %s3809_s27   ;;  %s4058_s1 = sadd.s32 1, %s3809_s27  }
  0x7c   : > { %s41_s19 = ssub.s32 %s3809_s27, %s4058_s1  ;;  %s44_s17 = sadd.s32 1, %s3805_s26 }
  0x7d   : > { %p42_p7 = scmp.eq.s32.totalorder %s41_s19, 0  ;;  %p51_p9 = scmp.ne.s32.totalorder %s3805_s26, %s3801_s25 }
  0x7e   : > { %p52_p11 = scmp.eq.s32.totalorder %s3809_s27, 0  ;;  %p57_p12 = scmp.ne.s32.totalorder %s3801_s25, %s3797_s24 }
  0x7f   : > { %s4069_s16 = scalar_select %p42_p7, %s3805_s26, %s44_s17  }
  0x80   : > { %p4071_p0 = por %p52_p11, %p51_p9  ;;  %p4077_p6 = por %p4349_p1, %p57_p12 }
  0x81   : > { %p417_p13 = scmp.eq.s32.totalorder %s3945_s0, 1  ;;  %p423_p2 = scmp.eq.s32.totalorder %s2714_s21, 1 }
  0x82   : > { %s4378_s29 = scalar_select %p4077_p6, 1, 0 }
  0x83   : > { %p3162_p5 = scmp.lt.s32.totalorder %s3809_s27, 2  ;;  %s571_s15 = sand.u32 1, %s3805_s26  }
  0x84   : > { %p4084_p8 = por %p417_p13, %p51_p9  ;;  %p4088_p10 = por %p423_p2, %p57_p12 }
  0x85   : > { %s2725_s14 = sshll.u32 %s571_s15, 6  ;;  %s2944_s22 = sshll.u32 %s3809_s27, 10 }
  0x86   : > { %s4379_s20 = scalar_select %p4084_p8, 1, 0 }
  0x87   : > { %s4380_s28 = scalar_select %p4088_p10, 1, 0 }
  0x88   : > { %s4381_s17 = sld [smem:[#allocation24_spill]]  ;;  %s575_s21 = scalar_lea.vmem [#allocation2], %s2725_s14 }
  0x89   : > { %s583_s3 = sshll.u32 %s575_s21, 4  ;;  %p4102_p7 = pnand %p3162_p5, %p4071_p0  ;;  %s4098_s3 = int_to_ptr.vmem [resolvable:$true] %s583_s3 }
  0x8a   : > { %s4106_s5 = scalar_lea.sflag [#allocation3], %s571_s15 }
  0x8b   : > { %p3703_p11 = pneg %p4102_p7 }
  0x8e   : > { %s4096_s2 = scalar_lea.hbm %s4381_s17, %s2944_s22  ;;  %s3706_s14 = scalar_lea.hbm %s4381_s17, 2048 }
  0x8f   : > { %s3701_s6 = scalar_lea.hbm %s4096_s2, 1024  ;;  %p3707_p0 = scmp.lt.s32.totalorder %s4096_s2, %s4381_s17 }
  0x90   : > { %p3702_p9 = scmp.ne.s32.totalorder %s4096_s2, %s3701_s6  ;;  %p3708_p2 = scmp.lt.s32.totalorder %s3706_s14, %s3701_s6 }
  0x92   : > { %p3704_p12 = pnand %p3703_p11, %p3702_p9  ;;  %p3709_p5 = por %p3708_p2, %p3707_p0 }
  0x94   : > { %p3705_p13 = pneg %p3704_p12 }
  0x96   : > { %p3710_p4 = pnand %p3709_p5, %p3705_p13 }
  0x98   : > { %3713 = shalt.err (!%p3710_p4)
}
  0x99   : > { %s3714_s18 = scalar_lea.vmem %s4098_s3, 1024  ;;  %s3825_s15 = smov [#allocation2]  }
  0x9a   : > { %p3715_p1 = scmp.ne.s32.totalorder %s4098_s3, %s3714_s18  ;;  %s3719_s7 = sshll.u32 %s3825_s15, 4  ;;  %s3720_s7 = int_to_ptr.vmem [resolvable:$false] %s3719_s7 }
  0x9b   : > { %s3721_s22 = scalar_lea.vmem %s3720_s7, 2048  ;;  %p3722_p12 = scmp.lt.s32.totalorder %s4098_s3, %s3720_s7 }
  0x9c   : > { %p3717_p10 = pnand %p3715_p1, %p3703_p11  ;;  %p3723_p8 = scmp.lt.s32.totalorder %s3721_s22, %s3714_s18 }
  0x9e   : > { %p3718_p9 = pneg %p3717_p10  ;;  %p3724_p6 = por %p3723_p8, %p3722_p12 }
  0xa0   : > { %p3725_p3 = pnand %p3724_p6, %p3718_p9 }
  0xa2   : > { %3728 = shalt.err (!%p3725_p3)
}
  0xa3   : > { %s3826_s6 = smov 512   ;;  %s3827_s23 = smov 32  }
  0xa4   : > { %3149 = dma.hbm_to_vmem [thread:$0]  (!%p4102_p7), %s4096_s2, 1024, %s4098_s3, %s4106_s5, %s3826_s6, %s3826_s6, %s3827_s23  }
  0xa5   : > { %p4383_p1 = scmp.ne.s32.totalorder %s4365_s30, 0 }
  0xa6   : > { %s4130_s14 = sand.u32 (!%p4383_p1), 1, %s3801_s25   ;;  %p4384_p3 = scmp.ne.s32.totalorder (!%p4383_p1), %s4378_s29, 0 }
  0xa7   : > { %595 = sbr.rel (%p4383_p1) target bundleno = 2026 (0x7ea), region = 88  ;;  %s2730_s7 = sshll.u32 (!%p4383_p1), %s4130_s14, 6 }
  0xa8   : > { %s598_s19 = scalar_lea.sflag (!%p4383_p1), [#allocation3], %s4130_s14  ;;  %s601_s21 = scalar_lea.vmem (!%p4383_p1), [#allocation2], %s2730_s7 }
  0xac   : > { %3772 = dma.done.wait (%p4384_p3), %s598_s19, 1024  }
  0xad   : > { %3774 = vsyncadd (%p4384_p3), %s598_s19, 4294966272  ;;  %p4385_p4 = scmp.eq.s32.totalorder %s3945_s0, 0 }
  0xaf   : > { %3776 = dma.done.wait (%p4385_p4), [#allocation6], 10240   ;;  %p4386_p6 = pmov %p4385_p4 }
  0xb0   : > { %p4387_p8 = pmov %p4385_p4 }
  0xb1   : > { %3778 = vsyncadd (%p4386_p6), [#allocation6], 4294957056 }
  0xb2   : > { %3780 = dma.done.wait (%p4387_p8), [#allocation9], 2048   ;;  %p4388_p10 = pmov %p4385_p4 }
  0xb3   : > { %p4389_p7 = pmov %p4385_p4 }
  0xb4   : > { %3782 = vsyncadd (%p4388_p10), [#allocation9], 4294965248 }
  0xb5   : > { %3784 = dma.done.wait (%p4389_p7), [#allocation12], 2048   ;;  %p4390_p11 = pmov %p4385_p4 }
  0xb6   : > { %p4391_p13 = pmov %p4385_p4 }
  0xb7   : > { %3786 = vsyncadd (%p4390_p11), [#allocation12], 4294965248 }
  0xb8   : > { %3788 = dma.done.wait (%p4391_p13), [#allocation15], 10240   ;;  %p4392_p0 = pmov %p4385_p4 }
  0xb9   : > { %v4156_v0 = vld [vmem:[%s601_s21] sm:$0xff]  ;;  %v4158_v1 = vld [vmem:[%s601_s21 + $0x8] sm:$0xff]  ;;  %v4160_v2 = vld [vmem:[%s601_s21 + $0x10] sm:$0xff]  ;;  %vm3829_vm0 = vmmov 0   ;;  %s4394_s4 = sld [smem:[#allocation33_spill]]  ;;  %s683_s18 = scalar_lea.vmem [#allocation17], %s2730_s7 }
  0xba   : > { %3790 = vsyncadd (%p4392_p0), [#allocation15], 4294957056  ;;  %v4162_v3 = vld [vmem:[%s601_s21 + $0x18] sm:$0xff]  ;;  %v695_v4 = vmul.f32 %v4156_v0, %v4156_v0  ;;  %v696_v5 = vmul.f32 %v4158_v1, %v4158_v1  ;;  %v697_v6 = vmul.f32 %v4160_v2, %v4160_v2  ;;  %v4170_v7 = vld [vmem:[%s601_s21 + $0x20] sm:$0xff]  ;;  %s4395_s29 = sld [smem:[#allocation34_spill]]  ;;  %s2565_s15 = sshll.u32 %s683_s18, 4  ;;  %s4279_s15 = int_to_ptr.vmem [resolvable:$true] %s2565_s15 }
  0xbb   : > { %v4172_v8 = vld [vmem:[%s601_s21 + $0x28] sm:$0xff]  ;;  %v4174_v9 = vld [vmem:[%s601_s21 + $0x30] sm:$0xff]  ;;  %v4176_v10 = vld [vmem:[%s601_s21 + $0x38] sm:$0xff]  ;;  %v699_v11 = vmul.f32 %v4170_v7, %v4170_v7  ;;  %v698_v13 = vmul.f32 %v4162_v3, %v4162_v3  ;;  %s4393_s21 = sld [smem:[#allocation32_spill]]  ;;  %s2946_s22 = sshll.u32 %s3945_s0, 10 }
  0xbc   : > { %v700_v12 = vmul.f32 %v4172_v8, %v4172_v8  ;;  %v703_v14 = vadd.f32 %v696_v5, %v695_v4  ;;  %v701_v15 = vmul.f32 %v4174_v9, %v4174_v9  ;;  %v3225_v16 = vld [vmem:[#allocation5 + $0x74] ss:$8 sps:$4 sm:$0xff]   ;;  %v3229_v19 = vld [vmem:[#allocation5 + $0x70] ss:$8 sps:$4 sm:$0xff]   ;;  %v702_v21 = vmul.f32 %v4176_v10, %v4176_v10  ;;  %v3231_v24 = vld [vmem:[#allocation5 + $0x64] ss:$8 sps:$4 sm:$0xff]  }
  0xbd   : > { %v3227_v18 = vld [vmem:[#allocation5 + $0x174] ss:$8 sps:$4 sm:$0xff]   ;;  %1128 = vmatprep.subr.bf16.mxu0 %v3225_v16  ;;  %v3230_v22 = vld [vmem:[#allocation5 + $0x170] ss:$8 sps:$4 sm:$0xff]   ;;  %v3233_v26 = vld [vmem:[#allocation5 + $0x164] ss:$8 sps:$4 sm:$0xff]  }
  0xbe   : > { %v708_v17 = vadd.f32 %v700_v12, %v699_v11  ;;  %v704_v20 = vadd.f32 %v703_v14, %v697_v6  ;;  %1171 = vmatprep.subr.bf16.mxu1 %v3227_v18  ;;  %1129 = vmatpush1.bf16.msra.mxu0 %v3229_v19  ;;  %v3235_v27 = vld [vmem:[#allocation5 + $0x60] ss:$8 sps:$4 sm:$0xff]   ;;  %v3237_v29 = vld [vmem:[#allocation5 + $0x54] ss:$8 sps:$4 sm:$0xff]   ;;  %v3241_v32 = vld [vmem:[#allocation5 + $0x50] ss:$8 sps:$4 sm:$0xff]  }
  0xbf   : > { %1172 = vmatpush1.bf16.msra.mxu1 %v3230_v22  ;;  %v3236_v28 = vld [vmem:[#allocation5 + $0x160] ss:$8 sps:$4 sm:$0xff]   ;;  %1130 = vmatprep.subr.bf16.mxu0 %v3231_v24  ;;  %v3239_v31 = vld [vmem:[#allocation5 + $0x154] ss:$8 sps:$4 sm:$0xff]   ;;  %v3242_v33 = vld [vmem:[#allocation5 + $0x150] ss:$8 sps:$4 sm:$0xff]  }
  0xc0   : > { %v709_v23 = vadd.f32 %v708_v17, %v701_v15  ;;  %v705_v25 = vadd.f32 %v704_v20, %v698_v13  ;;  %1173 = vmatprep.subr.bf16.mxu1 %v3233_v26  ;;  %v3243_v34 = vld [vmem:[#allocation5 + $0x44] ss:$8 sps:$4 sm:$0xff]   ;;  %v3247_v36 = vld [vmem:[#allocation5 + $0x40] ss:$8 sps:$4 sm:$0xff]   ;;  %v3249_v38 = vld [vmem:[#allocation5 + $0x34] ss:$8 sps:$4 sm:$0xff]  }
  0xc1   : > { %v3245_v35 = vld [vmem:[#allocation5 + $0x144] ss:$8 sps:$4 sm:$0xff]   ;;  %v3248_v37 = vld [vmem:[#allocation5 + $0x140] ss:$8 sps:$4 sm:$0xff]   ;;  %v3251_v39 = vld [vmem:[#allocation5 + $0x134] ss:$8 sps:$4 sm:$0xff]  }
  0xc2   : > { %706 = vadd.xlane.f32.xlu0 %v705_v25  ;;  %v710_v30 = vadd.f32 %v709_v23, %v702_v21  ;;  %1131 = vmatpush1.bf16.msra.mxu0 %v3235_v27  ;;  %v3253_v40 = vld [vmem:[#allocation5 + $0x30] ss:$8 sps:$4 sm:$0xff]   ;;  %v3255_v42 = vld [vmem:[#allocation5 + $0x24] ss:$8 sps:$4 sm:$0xff]   ;;  %v3259_v44 = vld [vmem:[#allocation5 + $0x20] ss:$8 sps:$4 sm:$0xff]  }
  0xc3   : > { %1174 = vmatpush1.bf16.msra.mxu1 %v3236_v28  ;;  %1132 = vmatprep.subr.bf16.mxu0 %v3237_v29  ;;  %v3254_v41 = vld [vmem:[#allocation5 + $0x130] ss:$8 sps:$4 sm:$0xff]   ;;  %v3257_v43 = vld [vmem:[#allocation5 + $0x124] ss:$8 sps:$4 sm:$0xff]   ;;  %v3260_v45 = vld [vmem:[#allocation5 + $0x120] ss:$8 sps:$4 sm:$0xff]  }
  0xc4   : > { %1175 = vmatprep.subr.bf16.mxu1 %v3239_v31  ;;  %v3261_v46 = vld [vmem:[#allocation5 + $0x14] ss:$8 sps:$4 sm:$0xff]   ;;  %v3265_v48 = vld [vmem:[#allocation5 + $0x10] ss:$8 sps:$4 sm:$0xff]   ;;  %v3267_v50 = vld [vmem:[#allocation5 + $0x4] ss:$8 sps:$4 sm:$0xff]  }
  0xc5   : > { %v3263_v47 = vld [vmem:[#allocation5 + $0x114] ss:$8 sps:$4 sm:$0xff]   ;;  %v3266_v49 = vld [vmem:[#allocation5 + $0x110] ss:$8 sps:$4 sm:$0xff]   ;;  %v3269_v51 = vld [vmem:[#allocation5 + $0x104] ss:$8 sps:$4 sm:$0xff]  }
  0xc6   : > { %711 = vadd.xlane.f32.xlu0 %v710_v30  ;;  %1133 = vmatpush1.bf16.msra.mxu0 %v3241_v32  ;;  %v3271_v52 = vld [vmem:[#allocation5] ss:$8 sps:$4 sm:$0xff]   ;;  %v3273_v54 = vld [vmem:[#allocation5 + $0xf4] ss:$8 sps:$4 sm:$0xff]   ;;  %v3277_v56 = vld [vmem:[#allocation5 + $0xf0] ss:$8 sps:$4 sm:$0xff]  }
  0xc7   : > { %1176 = vmatpush1.bf16.msra.mxu1 %v3242_v33  ;;  %1134 = vmatprep.subr.bf16.mxu0 %v3243_v34  ;;  %v3272_v53 = vld [vmem:[#allocation5 + $0x100] ss:$8 sps:$4 sm:$0xff]   ;;  %v3275_v55 = vld [vmem:[#allocation5 + $0x1f4] ss:$8 sps:$4 sm:$0xff]   ;;  %v3278_v57 = vld [vmem:[#allocation5 + $0x1f0] ss:$8 sps:$4 sm:$0xff]  }
  0xc8   : > { %1177 = vmatprep.subr.bf16.mxu1 %v3245_v35  ;;  %v3279_v58 = vld [vmem:[#allocation5 + $0xe4] ss:$8 sps:$4 sm:$0xff]   ;;  %v3283_v60 = vld [vmem:[#allocation5 + $0xe0] ss:$8 sps:$4 sm:$0xff]   ;;  %v3285_v62 = vld [vmem:[#allocation5 + $0xd4] ss:$8 sps:$4 sm:$0xff]  }
  0xc9   : > { %v3281_v59 = vld [vmem:[#allocation5 + $0x1e4] ss:$8 sps:$4 sm:$0xff]   ;;  %v3284_v61 = vld [vmem:[#allocation5 + $0x1e0] ss:$8 sps:$4 sm:$0xff]   ;;  %v3287_v63 = vld [vmem:[#allocation5 + $0x1d4] ss:$8 sps:$4 sm:$0xff]  }
  0xca   : > { %1135 = vmatpush1.bf16.msra.mxu0 %v3247_v36  ;;  %v3289_v4 = vld [vmem:[#allocation5 + $0xd0] ss:$8 sps:$4 sm:$0xff]   ;;  %v3291_v6 = vld [vmem:[#allocation5 + $0xc4] ss:$8 sps:$4 sm:$0xff]   ;;  %v3295_v12 = vld [vmem:[#allocation5 + $0xc0] ss:$8 sps:$4 sm:$0xff]  }
  0xcb   : > { %1178 = vmatpush1.bf16.msra.mxu1 %v3248_v37  ;;  %1136 = vmatprep.subr.bf16.mxu0 %v3249_v38  ;;  %v3290_v5 = vld [vmem:[#allocation5 + $0x1d0] ss:$8 sps:$4 sm:$0xff]   ;;  %v3293_v11 = vld [vmem:[#allocation5 + $0x1c4] ss:$8 sps:$4 sm:$0xff]   ;;  %v3296_v13 = vld [vmem:[#allocation5 + $0x1c0] ss:$8 sps:$4 sm:$0xff]  }
  0xcc   : > { %1179 = vmatprep.subr.bf16.mxu1 %v3251_v39  ;;  %v3297_v14 = vld [vmem:[#allocation5 + $0xb4] ss:$8 sps:$4 sm:$0xff]   ;;  %v3301_v16 = vld [vmem:[#allocation5 + $0xb0] ss:$8 sps:$4 sm:$0xff]   ;;  %v3303_v18 = vld [vmem:[#allocation5 + $0xa4] ss:$8 sps:$4 sm:$0xff]  }
  0xcd   : > { %v3299_v15 = vld [vmem:[#allocation5 + $0x1b4] ss:$8 sps:$4 sm:$0xff]   ;;  %v3302_v17 = vld [vmem:[#allocation5 + $0x1b0] ss:$8 sps:$4 sm:$0xff]   ;;  %v3305_v19 = vld [vmem:[#allocation5 + $0x1a4] ss:$8 sps:$4 sm:$0xff]  }
  0xce   : > { %1137 = vmatpush1.bf16.msra.mxu0 %v3253_v40  ;;  %v3307_v20 = vld [vmem:[#allocation5 + $0xa0] ss:$8 sps:$4 sm:$0xff]   ;;  %v3309_v22 = vld [vmem:[#allocation5 + $0x94] ss:$8 sps:$4 sm:$0xff]   ;;  %v3313_v24 = vld [vmem:[#allocation5 + $0x90] ss:$8 sps:$4 sm:$0xff]  }
  0xcf   : > { %1180 = vmatpush1.bf16.msra.mxu1 %v3254_v41  ;;  %1138 = vmatprep.subr.bf16.mxu0 %v3255_v42  ;;  %v3308_v21 = vld [vmem:[#allocation5 + $0x1a0] ss:$8 sps:$4 sm:$0xff]   ;;  %v3311_v23 = vld [vmem:[#allocation5 + $0x194] ss:$8 sps:$4 sm:$0xff]   ;;  %v3314_v25 = vld [vmem:[#allocation5 + $0x190] ss:$8 sps:$4 sm:$0xff]  }
  0xd0   : > { %1181 = vmatprep.subr.bf16.mxu1 %v3257_v43  ;;  %v3315_v26 = vld [vmem:[#allocation5 + $0x84] ss:$8 sps:$4 sm:$0xff]   ;;  %v3319_v28 = vld [vmem:[#allocation5 + $0x80] ss:$8 sps:$4 sm:$0xff]   ;;  %v3321_v30 = vld [vmem:[#allocation7 + $0x78] sm:$0xff]   ;;  %s4396_s23 = sld [smem:[#allocation35_spill]] }
  0xd1   : > { %v3317_v27 = vld [vmem:[#allocation5 + $0x184] ss:$8 sps:$4 sm:$0xff]   ;;  %v3320_v29 = vld [vmem:[#allocation5 + $0x180] ss:$8 sps:$4 sm:$0xff]   ;;  %s2551_s0 = scalar_lea.sflag [#allocation4], %s4130_s14  ;;  %p4397_p5 = scmp.ne.s32.totalorder %s4379_s20, 0 }
  0xd2   : > { %1139 = vmatpush1.bf16.msra.mxu0 %v3259_v44  ;;  %s3831_s2 = smov [#allocation17]  }
  0xd3   : > { %1182 = vmatpush1.bf16.msra.mxu1 %v3260_v45  ;;  %1140 = vmatprep.subr.bf16.mxu0 %v3261_v46  ;;  %s3733_s3 = sshll.u32 %s3831_s2, 4  ;;  %s3734_s3 = int_to_ptr.vmem [resolvable:$false] %s3733_s3 }
  0xd4   : > { %1183 = vmatprep.subr.bf16.mxu1 %v3263_v47  ;;  %p3736_p1 = scmp.lt.s32.totalorder %s4279_s15, %s3734_s3 }
  0xd6   : > { %1141 = vmatpush1.bf16.msra.mxu0 %v3265_v48  ;;  %s4284_s19 = scalar_lea.hbm %s4396_s23, %s2946_s22 }
  0xd7   : > { %1184 = vmatpush1.bf16.msra.mxu1 %v3266_v49  ;;  %1142 = vmatprep.subr.bf16.mxu0 %v3267_v50 }
  0xd8   : > { %1185 = vmatprep.subr.bf16.mxu1 %v3269_v51  ;;  %v3322_v51 = vld [vmem:[#allocation7 + $0x38] sm:$0xff]  }
  0xda   : > { %1143 = vmatpush1.bf16.msra.mxu0 %v3271_v52  ;;  %v3331_v52 = vld [vmem:[#allocation7 + $0x50] sm:$0xff]  }
  0xdb   : > { %1186 = vmatpush1.bf16.msra.mxu1 %v3272_v53  ;;  %1144 = vmatprep.subr.bf16.mxu0 %v3273_v54  ;;  %v3332_v53 = vld [vmem:[#allocation7 + $0x10] sm:$0xff]   ;;  %v3333_v54 = vld [vmem:[#allocation7 + $0x48] sm:$0xff]  }
  0xdc   : > { %1187 = vmatprep.subr.bf16.mxu1 %v3275_v55  ;;  %v3334_v55 = vld [vmem:[#allocation7 + $0x8] sm:$0xff]  }
  0xde   : > { %1145 = vmatpush2.bf16.msra.mxu0 %v3277_v56  ;;  %v3335_v56 = vld [vmem:[#allocation7 + $0x40] sm:$0xff]  }
  0xdf   : > { %1188 = vmatpush2.bf16.msra.mxu1 %v3278_v57  ;;  %1146 = vmatprep.subr.bf16.mxu0 %v3279_v58  ;;  %v3336_v57 = vld [vmem:[#allocation7] sm:$0xff]   ;;  %v3337_v58 = vld [vmem:[#allocation8 + $0x38] sm:$0xff]  }
  0xe0   : > { %1189 = vmatprep.subr.bf16.mxu1 %v3281_v59  ;;  %v3828_v59 = vmov 0.0  }
  0xe2   : > { %1147 = vmatpush2.bf16.msra.mxu0 %v3283_v60  ;;  %v3338_v60 = vld [vmem:[#allocation8 + $0x30] sm:$0xff]  }
  0xe3   : > { %1190 = vmatpush2.bf16.msra.mxu1 %v3284_v61  ;;  %1148 = vmatprep.subr.bf16.mxu0 %v3285_v62  ;;  %v3339_v61 = vld [vmem:[#allocation8 + $0x28] sm:$0xff]   ;;  %v3340_v62 = vld [vmem:[#allocation8 + $0x20] sm:$0xff]  }
  0xe4   : > { %1191 = vmatprep.subr.bf16.mxu1 %v3287_v63  ;;  %v798_v63 = vlaneseq }
  0xe6   : > { %1149 = vmatpush2.bf16.msra.mxu0 %v3289_v4  ;;  %v4202_v4 = vshrl.u32 %v798_v63, 7  ;;  %v3357_v63 = vld [vmem:[#allocation11 + $0x18] sm:$0xff]  }
  0xe7   : > { %1192 = vmatpush2.bf16.msra.mxu1 %v3290_v5  ;;  %1150 = vmatprep.subr.bf16.mxu0 %v3291_v6  ;;  %v796_v6 = vld [vmem:[%s4336_s9] sm:$0x3] }
  0xe8   : > { %1193 = vmatprep.subr.bf16.mxu1 %v3293_v11  ;;  %v4205_v5 = vsub.s32 0, %v4202_v4  ;;  %v4211_v11 = vsub.s32 1, %v4202_v4 }
  0xea   : > { %1151 = vmatpush2.bf16.msra.mxu0 %v3295_v12  ;;  %v801_v12 = vrot.slane %v796_v6, %v4205_v5 }
  0xeb   : > { %1194 = vmatpush2.bf16.msra.mxu1 %v3296_v13  ;;  %1152 = vmatprep.subr.bf16.mxu0 %v3297_v14  ;;  %v805_v13 = vrot.slane %v796_v6, %v4211_v11  ;;  %v2821_v6 = vld [vmem:[%s4338_s11] ss:$0 sm:$0xff] }
  0xec   : > { %1195 = vmatprep.subr.bf16.mxu1 %v3299_v15 }
  0xee   : > { %1153 = vmatpush2.bf16.msra.mxu0 %v3301_v16 }
  0xef   : > { %1196 = vmatpush2.bf16.msra.mxu1 %v3302_v17  ;;  %1154 = vmatprep.subr.bf16.mxu0 %v3303_v18 }
  0xf0   : > { %1197 = vmatprep.subr.bf16.mxu1 %v3305_v19 }
  0xf2   : > { %1155 = vmatpush2.bf16.msra.mxu0 %v3307_v20 }
  0xf3   : > { %1198 = vmatpush2.bf16.msra.mxu1 %v3308_v21  ;;  %1156 = vmatprep.subr.bf16.mxu0 %v3309_v22 }
  0xf4   : > { %1199 = vmatprep.subr.bf16.mxu1 %v3311_v23 }
  0xf6   : > { %1157 = vmatpush2.bf16.msra.mxu0 %v3313_v24 }
  0xf7   : > { %1200 = vmatpush2.bf16.msra.mxu1 %v3314_v25  ;;  %1158 = vmatprep.subr.bf16.mxu0 %v3315_v26 }
  0xf8   : > { %1201 = vmatprep.subr.bf16.mxu1 %v3317_v27 }
  0xfa   : > { %1159 = vmatpush2.bf16.msra.mxu0 %v3319_v28 }
  0xfb   : > { %1202 = vmatpush2.bf16.msra.mxu1 %v3320_v29  ;;  %2947 = vmatprep.subr.bf16.mxu0 %v3321_v30 }
  0xfc   : > { %3005 = vmatprep.subr.bf16.mxu1 %v3828_v59 }
 0x14b   : > { %v707_v31 = vpop.xlane.xlu0 %706 }
 0x14c   : > { %v714_v32 = vmul.f32 0.001953125, %v707_v31 }
 0x14e   : > { %v716_v33 = vadd.f32 1e-08, %v714_v32 }
 0x14f   : > { %v712_v34 = vpop.xlane.xlu0 %711 }
 0x150   : > { %v715_v35 = vmul.f32 0.001953125, %v712_v34  ;;  %3489 = vrsqrt.f32 %v716_v33 }
 0x152   : > { %v717_v36 = vadd.f32 1e-08, %v715_v35 }
 0x154   : > { %3491 = vrsqrt.f32 %v717_v36 }
 0x15d   : > { %v3490_v37 = vpop.eup %3489 }
 0x15e   : > { %v721_v39 = vmul.f32 %v3490_v37, %v4158_v1  ;;  %v723_v40 = vmul.f32 %v3490_v37, %v4162_v3  ;;  %v720_v41 = vmul.f32 %v3490_v37, %v4156_v0  ;;  %v722_v42 = vmul.f32 %v3490_v37, %v4160_v2  ;;  %v3323_v1 = vld [vmem:[#allocation7 + $0x70] sm:$0xff]   ;;  %v3325_v2 = vld [vmem:[#allocation7 + $0x68] sm:$0xff]  }
 0x15f   : > { %v3324_v0 = vld [vmem:[#allocation7 + $0x30] sm:$0xff]   ;;  %v3326_v3 = vld [vmem:[#allocation7 + $0x28] sm:$0xff]  }
 0x161   : > { %v3492_v38 = vpop.eup %3491 }
 0x162   : > { %v725_v43 = vmul.f32 %v3492_v38, %v4172_v8  ;;  %v727_v44 = vmul.f32 %v3492_v38, %v4176_v10  ;;  %v724_v45 = vmul.f32 %v3492_v38, %v4170_v7  ;;  %v726_v46 = vmul.f32 %v3492_v38, %v4174_v9  ;;  %v3327_v7 = vld [vmem:[#allocation7 + $0x60] sm:$0xff]   ;;  %v3329_v9 = vld [vmem:[#allocation7 + $0x58] sm:$0xff]  }
 0x163   : > { %v3328_v8 = vld [vmem:[#allocation7 + $0x20] sm:$0xff]   ;;  %v3330_v10 = vld [vmem:[#allocation7 + $0x18] sm:$0xff]  }
 0x164   : > { %v729_v47 = vpack.c.bf16 %v725_v43, %v721_v39  ;;  %v731_v48 = vpack.c.bf16 %v727_v44, %v723_v40  ;;  %v728_v49 = vpack.c.bf16 %v724_v45, %v720_v41  ;;  %v730_v50 = vpack.c.bf16 %v726_v46, %v722_v42  ;;  %v3341_v40 = vld [vmem:[#allocation8 + $0x18] sm:$0xff]   ;;  %v3342_v41 = vld [vmem:[#allocation8 + $0x10] sm:$0xff]   ;;  %v3343_v42 = vld [vmem:[#allocation8 + $0x8] sm:$0xff]  }
 0x165   : > { %v3344_v43 = vld [vmem:[#allocation8] sm:$0xff]   ;;  %v3345_v44 = vld [vmem:[#allocation10 + $0x38] sm:$0xff]   ;;  %v3346_v45 = vld [vmem:[#allocation10 + $0x30] sm:$0xff]  }
 0x166   : > { %1160 = vmatprep.mubr.bf16.mxu0 %v729_v47  ;;  %1203 = vmatprep.mubr.bf16.mxu1 %v731_v48  ;;  %v3347_v46 = vld [vmem:[#allocation10 + $0x28] sm:$0xff]   ;;  %v3348_v47 = vld [vmem:[#allocation10 + $0x20] sm:$0xff]   ;;  %v3349_v48 = vld [vmem:[#allocation10 + $0x18] sm:$0xff]  }
 0x167   : > { %1161 = vmatmul.mubr.bf16.vlgmr.msra.gmra.mxu0 %v728_v49  ;;  %1204 = vmatmul.mubr.bf16.vlgmr.msra.gmra.mxu1 %v730_v50  ;;  %v2804_v50 = vld [vmem:[%s4337_s10] ss:$0 sm:$0xff] }
 0x168   : > { %2948 = vmatpush3.bf16.msra.mxu0 %v3322_v51  ;;  %3006 = vmatpush3.bf16.msra.mxu1 %v3337_v58  ;;  %v3353_v58 = vld [vmem:[#allocation11 + $0x38] sm:$0xff]  }
 0x169   : > { %2949 = vmatprep.subr.bf16.mxu0 %v3323_v1  ;;  %3007 = vmatprep.subr.bf16.mxu1 %v3828_v59 }
 0x16a   : > { %3021 = vmatprep.mubr.msk.bf16.mxu1 %vm3829_vm0, %v3828_v59 }
 0x16c   : > { %2950 = vmatpush3.bf16.msra.mxu0 %v3324_v0  ;;  %3008 = vmatpush3.bf16.msra.mxu1 %v3338_v60  ;;  %v3354_v60 = vld [vmem:[#allocation11 + $0x30] sm:$0xff]  }
 0x16d   : > { %2951 = vmatprep.subr.bf16.mxu0 %v3325_v2  ;;  %3009 = vmatprep.subr.bf16.mxu1 %v3828_v59 }
 0x170   : > { %2952 = vmatpush3.bf16.msra.mxu0 %v3326_v3  ;;  %3010 = vmatpush3.bf16.msra.mxu1 %v3339_v61  ;;  %v3355_v61 = vld [vmem:[#allocation11 + $0x28] sm:$0xff]  }
 0x171   : > { %2953 = vmatprep.subr.bf16.mxu0 %v3327_v7  ;;  %3011 = vmatprep.subr.bf16.mxu1 %v3828_v59 }
 0x174   : > { %2954 = vmatpush3.bf16.msra.mxu0 %v3328_v8  ;;  %3012 = vmatpush3.bf16.msra.mxu1 %v3340_v62  ;;  %v3356_v62 = vld [vmem:[#allocation11 + $0x20] sm:$0xff]  }
 0x175   : > { %2955 = vmatprep.subr.bf16.mxu0 %v3329_v9  ;;  %3013 = vmatprep.subr.bf16.mxu1 %v3828_v59 }
 0x178   : > { %2956 = vmatpush3.bf16.msra.mxu0 %v3330_v10  ;;  %3014 = vmatpush3.bf16.msra.mxu1 %v3341_v40 }
 0x179   : > { %2957 = vmatprep.subr.bf16.mxu0 %v3331_v52  ;;  %3015 = vmatprep.subr.bf16.mxu1 %v3828_v59 }
 0x17c   : > { %2958 = vmatpush3.bf16.msra.mxu0 %v3332_v53  ;;  %3016 = vmatpush3.bf16.msra.mxu1 %v3342_v41 }
 0x17d   : > { %2959 = vmatprep.subr.bf16.mxu0 %v3333_v54  ;;  %3017 = vmatprep.subr.bf16.mxu1 %v3828_v59 }
 0x180   : > { %2960 = vmatpush3.bf16.msra.mxu0 %v3334_v55  ;;  %3018 = vmatpush3.bf16.msra.mxu1 %v3343_v42  ;;  %v3350_v55 = vld [vmem:[#allocation10 + $0x10] sm:$0xff]  }
 0x181   : > { %2961 = vmatprep.subr.bf16.mxu0 %v3335_v56  ;;  %3019 = vmatprep.subr.bf16.mxu1 %v3828_v59  ;;  %v3351_v56 = vld [vmem:[#allocation10 + $0x8] sm:$0xff]  }
 0x184   : > { %2962 = vmatpush3.bf16.msra.mxu0 %v3336_v57  ;;  %3020 = vmatpush3.bf16.msra.mxu1 %v3344_v43  ;;  %v3352_v57 = vld [vmem:[#allocation10] sm:$0xff]   ;;  %v3366_v43 = vld [vmem:[#allocation13 + $0x10] sm:$0xff]  }
 0x185   : > { %3025 = vmatprep.subr.bf16.mxu0 %v3828_v59  ;;  %3045 = vmatprep.subr.bf16.mxu1 %v3828_v59 }
 0x227   : > { %v1162_v14 = vpop.f32.mrf.mxu0  ;;  %v1205_v15 = vpop.f32.mrf.mxu1 }
 0x228   : > { %v1163_v16 = vadd.f32 %v1162_v14, %v801_v12 }
 0x229   : > { %v1164_v17 = vpop.f32.mrf.mxu0  ;;  %v1207_v18 = vpop.f32.mrf.mxu1 }
 0x22a   : > { %v1165_v19 = vadd.f32 %v1164_v17, %v805_v13  ;;  %v1206_v24 = vadd.f32 %v1205_v15, %v1163_v16 }
 0x22b   : > { %v1166_v20 = vpop.f32.mrf.mxu0  ;;  %v1209_v21 = vpop.f32.mrf.mxu1 }
 0x22c   : > { %v1208_v22 = vadd.f32 %v1207_v18, %v1165_v19  ;;  %v1167_v23 = vadd.f32 %v1166_v20, %v801_v12  ;;  %v1214_v32 = vmul.f32 0.2, %v1206_v24 }
 0x22d   : > { %v1168_v25 = vpop.f32.mrf.mxu0  ;;  %v1211_v28 = vpop.f32.mrf.mxu1 }
 0x22e   : > { %v1210_v26 = vadd.f32 %v1209_v21, %v1167_v23  ;;  %v1169_v27 = vadd.f32 %v1168_v25, %v805_v13  ;;  %v1215_v29 = vmul.f32 0.2, %v1208_v22  ;;  %v1218_v37 = vmax.f32 %v1206_v24, %v1214_v32  ;;  %v3358_v23 = vld [vmem:[#allocation11 + $0x10] sm:$0xff]   ;;  %v3359_v24 = vld [vmem:[#allocation11 + $0x8] sm:$0xff]   ;;  %v3360_v25 = vld [vmem:[#allocation11] sm:$0xff]  }
 0x230   : > { %v1216_v30 = vmul.f32 0.2, %v1210_v26  ;;  %v1212_v31 = vadd.f32 %v1211_v28, %v1169_v27  ;;  %v1219_v35 = vmax.f32 %v1208_v22, %v1215_v29  ;;  %v3362_v27 = vld [vmem:[#allocation13 + $0x30] sm:$0xff]   ;;  %v3363_v28 = vld [vmem:[#allocation13 + $0x28] sm:$0xff]   ;;  %v3364_v29 = vld [vmem:[#allocation13 + $0x20] sm:$0xff]  }
 0x232   : > { %v1217_v33 = vmul.f32 0.2, %v1212_v31  ;;  %v1220_v34 = vmax.f32 %v1210_v26, %v1216_v30  ;;  %v3361_v26 = vld [vmem:[#allocation13 + $0x38] sm:$0xff]  }
 0x233   : > { %v3365_v30 = vld [vmem:[#allocation13 + $0x18] sm:$0xff]  }
 0x234   : > { %v1221_v36 = vmax.f32 %v1212_v31, %v1217_v33  ;;  %v1222_v39 = vpack.c.bf16 %v1220_v34, %v1218_v37  ;;  %v2830_v31 = vld [vmem:[%s4339_s12] ss:$0 sm:$0xff] }
 0x236   : > { %v1223_v38 = vpack.c.bf16 %v1221_v36, %v1219_v35 }
 0x238   : > { %1391 = vmatprep.mubr.bf16.mxu0 %v1223_v38 }
 0x239   : > { %1392 = vmatmul.mubr.bf16.vlgmr.msra.gmra.mxu0 %v1222_v39 }
 0x23a   : > { %3041 = vmatprep.mubr.msk.bf16.mxu0 %vm3829_vm0, %v3828_v59  ;;  %3026 = vmatpush3.bf16.msra.mxu0 %v3345_v44  ;;  %v3367_v44 = vld [vmem:[#allocation13 + $0x8] sm:$0xff]  }
 0x23b   : > { %3027 = vmatprep.subr.bf16.mxu0 %v3828_v59 }
 0x23e   : > { %3028 = vmatpush3.bf16.msra.mxu0 %v3346_v45  ;;  %v3368_v45 = vld [vmem:[#allocation13] sm:$0xff]  }
 0x23f   : > { %3029 = vmatprep.subr.bf16.mxu0 %v3828_v59 }
 0x242   : > { %3030 = vmatpush3.bf16.msra.mxu0 %v3347_v46  ;;  %v3369_v46 = vld [vmem:[#allocation14 + $0x70] ss:$8 sps:$4 sm:$0xff]  }
 0x243   : > { %3031 = vmatprep.subr.bf16.mxu0 %v3828_v59 }
 0x246   : > { %3032 = vmatpush3.bf16.msra.mxu0 %v3348_v47  ;;  %v3371_v47 = vld [vmem:[#allocation14 + $0x74] ss:$8 sps:$4 sm:$0xff]  }
 0x247   : > { %3033 = vmatprep.subr.bf16.mxu0 %v3828_v59 }
 0x24a   : > { %3034 = vmatpush3.bf16.msra.mxu0 %v3349_v48  ;;  %v3374_v48 = vld [vmem:[#allocation14 + $0x64] ss:$8 sps:$4 sm:$0xff]  }
 0x24b   : > { %3035 = vmatprep.subr.bf16.mxu0 %v3828_v59 }
 0x24e   : > { %3036 = vmatpush3.bf16.msra.mxu0 %v3350_v55 }
 0x24f   : > { %3037 = vmatprep.subr.bf16.mxu0 %v3828_v59 }
 0x252   : > { %3038 = vmatpush3.bf16.msra.mxu0 %v3351_v56 }
 0x253   : > { %3039 = vmatprep.subr.bf16.mxu0 %v3828_v59 }
 0x256   : > { %3040 = vmatpush3.bf16.msra.mxu0 %v3352_v57 }
 0x257   : > { %3065 = vmatprep.subr.bf16.mxu0 %v3828_v59 }
 0x2f9   : > { %v2963_v49 = vpop.f32.mrf.mxu0 }
 0x2fb   : > { %v2964_v51 = vpop.f32.mrf.mxu0 }
 0x2fc   : > { %v2965_v1 = vadd.f32 %v2964_v51, %v2963_v49  ;;  %v3372_v49 = vld [vmem:[#allocation14 + $0x60] ss:$8 sps:$4 sm:$0xff]   ;;  %v3375_v51 = vld [vmem:[#allocation14 + $0x50] ss:$8 sps:$4 sm:$0xff]  }
 0x2fd   : > { %v2966_v0 = vpop.f32.mrf.mxu0 }
 0x2fe   : > { %v1394_v2 = vadd.f32 %v2965_v1, %v2804_v50  ;;  %v3380_v1 = vld [vmem:[#allocation14 + $0x44] ss:$8 sps:$4 sm:$0xff]  }
 0x2ff   : > { %v2967_v3 = vpop.f32.mrf.mxu0 }
 0x300   : > { %v2968_v7 = vadd.f32 %v2967_v3, %v2966_v0  ;;  %v1400_v8 = vmul.f32 0.2, %v1394_v2  ;;  %v3378_v0 = vld [vmem:[#allocation14 + $0x40] ss:$8 sps:$4 sm:$0xff]  }
 0x301   : > { %v2839_v3 = vld [vmem:[%s4340_s13] ss:$0 sm:$0xff] }
 0x302   : > { %v1397_v9 = vadd.f32 %v2968_v7, %v2804_v50  ;;  %v1402_v52 = vmax.f32 %v1394_v2, %v1400_v8  ;;  %v3377_v50 = vld [vmem:[#allocation14 + $0x54] ss:$8 sps:$4 sm:$0xff]  }
 0x303   : > { %v3383_v2 = vld [vmem:[#allocation14 + $0x34] ss:$8 sps:$4 sm:$0xff]  }
 0x304   : > { %v1401_v10 = vmul.f32 0.2, %v1397_v9 }
 0x306   : > { %v1403_v53 = vmax.f32 %v1397_v9, %v1401_v10 }
 0x308   : > { %v1404_v54 = vpack.c.bf16 %v1403_v53, %v1402_v52 }
 0x30a   : > { %3022 = vmatmul.mubr.bf16.vlgmr.msra.gmra.mxu1 %v1404_v54 }
 0x30b   : > { %3061 = vmatprep.mubr.msk.bf16.mxu1 %vm3829_vm0, %v3828_v59  ;;  %3046 = vmatpush3.bf16.msra.mxu1 %v3353_v58 }
 0x30c   : > { %3047 = vmatprep.subr.bf16.mxu1 %v3828_v59 }
 0x30f   : > { %3048 = vmatpush3.bf16.msra.mxu1 %v3354_v60  ;;  %v3386_v60 = vld [vmem:[#allocation14 + $0x24] ss:$8 sps:$4 sm:$0xff]  }
 0x310   : > { %3049 = vmatprep.subr.bf16.mxu1 %v3828_v59 }
 0x313   : > { %3050 = vmatpush3.bf16.msra.mxu1 %v3355_v61  ;;  %v3384_v61 = vld [vmem:[#allocation14 + $0x20] ss:$8 sps:$4 sm:$0xff]  }
 0x314   : > { %3051 = vmatprep.subr.bf16.mxu1 %v3828_v59 }
 0x317   : > { %3052 = vmatpush3.bf16.msra.mxu1 %v3356_v62  ;;  %v3389_v62 = vld [vmem:[#allocation14 + $0x14] ss:$8 sps:$4 sm:$0xff]  }
 0x318   : > { %3053 = vmatprep.subr.bf16.mxu1 %v3828_v59 }
 0x31b   : > { %3054 = vmatpush3.bf16.msra.mxu1 %v3357_v63  ;;  %v3387_v63 = vld [vmem:[#allocation14 + $0x10] ss:$8 sps:$4 sm:$0xff]  }
 0x31c   : > { %3055 = vmatprep.subr.bf16.mxu1 %v3828_v59 }
 0x31f   : > { %3056 = vmatpush3.bf16.msra.mxu1 %v3358_v23  ;;  %v3419_v23 = vld [vmem:[#allocation16 + $0x64] ss:$16 sps:$4 sm:$0xff]  }
 0x320   : > { %3057 = vmatprep.subr.bf16.mxu1 %v3828_v59 }
 0x323   : > { %3058 = vmatpush3.bf16.msra.mxu1 %v3359_v24  ;;  %v3417_v24 = vld [vmem:[#allocation16 + $0x60] ss:$16 sps:$4 sm:$0xff]  }
 0x324   : > { %3059 = vmatprep.subr.bf16.mxu1 %v3828_v59 }
 0x327   : > { %3060 = vmatpush3.bf16.msra.mxu1 %v3360_v25  ;;  %v3425_v25 = vld [vmem:[#allocation16 + $0x44] ss:$16 sps:$4 sm:$0xff]  }
 0x328   : > { %1981 = vmatprep.subr.bf16.mxu1 %v3371_v47 }
 0x3ca   : > { %v1510_v12 = vpop.f32.mrf.mxu1 }
 0x3cb   : > { %v1511_v13 = vadd.f32 %v2821_v6, %v1510_v12  ;;  %v3390_v12 = vld [vmem:[#allocation14] ss:$8 sps:$4 sm:$0xff]  }
 0x3cc   : > { %v3023_v14 = vpop.f32.mrf.mxu1 }
 0x3cd   : > { %v1517_v16 = vmul.f32 0.2, %v1511_v13  ;;  %v3393_v14 = vld [vmem:[#allocation16 + $0xe0] ss:$16 sps:$4 sm:$0xff]  }
 0x3ce   : > { %v1513_v15 = vpop.f32.mrf.mxu1 }
 0x3cf   : > { %v1514_v17 = vadd.f32 %v2821_v6, %v1513_v15  ;;  %v1519_v20 = vmax.f32 %v1511_v13, %v1517_v16  ;;  %v3392_v6 = vld [vmem:[#allocation14 + $0x4] ss:$8 sps:$4 sm:$0xff]   ;;  %v3830_v13 = vmov 0  }
 0x3d0   : > { %v3024_v18 = vpop.f32.mrf.mxu1  ;;  %v3395_v15 = vld [vmem:[#allocation16 + $0xe4] ss:$16 sps:$4 sm:$0xff]   ;;  %v3398_v16 = vld [vmem:[#allocation16 + $0xec] ss:$16 sps:$4 sm:$0xff]  }
 0x3d1   : > { %v1518_v19 = vmul.f32 0.2, %v1514_v17  ;;  %v3399_v18 = vld [vmem:[#allocation16 + $0xc0] ss:$16 sps:$4 sm:$0xff]  }
 0x3d3   : > { %v1520_v21 = vmax.f32 %v1514_v17, %v1518_v19  ;;  %v3401_v17 = vld [vmem:[#allocation16 + $0xc4] ss:$16 sps:$4 sm:$0xff]  }
 0x3d4   : > { %v3407_v19 = vld [vmem:[#allocation16 + $0xa4] ss:$16 sps:$4 sm:$0xff]  }
 0x3d5   : > { %v1521_v22 = vpack.c.bf16 %v1520_v21, %v1519_v20  ;;  %v3405_v20 = vld [vmem:[#allocation16 + $0xa0] ss:$16 sps:$4 sm:$0xff]   ;;  %v3413_v21 = vld [vmem:[#allocation16 + $0x84] ss:$16 sps:$4 sm:$0xff]  }
 0x3d7   : > { %3042 = vmatmul.mubr.bf16.vlgmr.msra.gmra.mxu0 %v1521_v22  ;;  %v3411_v22 = vld [vmem:[#allocation16 + $0x80] ss:$16 sps:$4 sm:$0xff]  }
 0x3d8   : > { %3081 = vmatprep.mubr.msk.bf16.mxu0 %vm3829_vm0, %v3828_v59  ;;  %3066 = vmatpush3.bf16.msra.mxu0 %v3361_v26  ;;  %v3423_v26 = vld [vmem:[#allocation16 + $0x40] ss:$16 sps:$4 sm:$0xff]  }
 0x3d9   : > { %3067 = vmatprep.subr.bf16.mxu0 %v3828_v59 }
 0x3dc   : > { %3068 = vmatpush3.bf16.msra.mxu0 %v3362_v27  ;;  %v3431_v27 = vld [vmem:[#allocation16 + $0x24] ss:$16 sps:$4 sm:$0xff]  }
 0x3dd   : > { %3069 = vmatprep.subr.bf16.mxu0 %v3828_v59 }
 0x3e0   : > { %3070 = vmatpush3.bf16.msra.mxu0 %v3363_v28  ;;  %v3429_v28 = vld [vmem:[#allocation16 + $0x20] ss:$16 sps:$4 sm:$0xff]  }
 0x3e1   : > { %3071 = vmatprep.subr.bf16.mxu0 %v3828_v59 }
 0x3e4   : > { %3072 = vmatpush3.bf16.msra.mxu0 %v3364_v29  ;;  %v3437_v29 = vld [vmem:[#allocation16 + $0x4] ss:$16 sps:$4 sm:$0xff]  }
 0x3e5   : > { %3073 = vmatprep.subr.bf16.mxu0 %v3828_v59 }
 0x3e8   : > { %3074 = vmatpush3.bf16.msra.mxu0 %v3365_v30  ;;  %v3435_v30 = vld [vmem:[#allocation16] ss:$16 sps:$4 sm:$0xff]  }
 0x3e9   : > { %3075 = vmatprep.subr.bf16.mxu0 %v3828_v59 }
 0x3ec   : > { %3076 = vmatpush3.bf16.msra.mxu0 %v3366_v43 }
 0x3ed   : > { %3077 = vmatprep.subr.bf16.mxu0 %v3828_v59 }
 0x3f0   : > { %3078 = vmatpush3.bf16.msra.mxu0 %v3367_v44 }
 0x3f1   : > { %3079 = vmatprep.subr.bf16.mxu0 %v3828_v59  ;;  %v3381_v59 = vld [vmem:[#allocation14 + $0x30] ss:$8 sps:$4 sm:$0xff]  }
 0x3f4   : > { %3080 = vmatpush3.bf16.msra.mxu0 %v3368_v45 }
 0x3f5   : > { %2440 = vmatprep.subr.bf16.mxu0 %v3395_v15  ;;  %v3465_v15 = vld [vmem:[#allocation16 + $0x160] ss:$16 sps:$4 sm:$0xff]  }
 0x497   : > { %v1627_v32 = vpop.f32.mrf.mxu0 }
 0x498   : > { %v1628_v33 = vadd.f32 %v2830_v31, %v1627_v32  ;;  %v3441_v32 = vld [vmem:[#allocation16 + $0x1e0] ss:$16 sps:$4 sm:$0xff]  }
 0x499   : > { %v3043_v34 = vpop.f32.mrf.mxu0 }
 0x49a   : > { %v1634_v36 = vmul.f32 0.2, %v1628_v33  ;;  %v3447_v34 = vld [vmem:[#allocation16 + $0x1c0] ss:$16 sps:$4 sm:$0xff]  }
 0x49b   : > { %v1630_v35 = vpop.f32.mrf.mxu0 }
 0x49c   : > { %v1631_v37 = vadd.f32 %v2830_v31, %v1630_v35  ;;  %v1636_v40 = vmax.f32 %v1628_v33, %v1634_v36  ;;  %v3443_v31 = vld [vmem:[#allocation16 + $0x1e4] ss:$16 sps:$4 sm:$0xff]   ;;  %v3453_v36 = vld [vmem:[#allocation16 + $0x1a0] ss:$16 sps:$4 sm:$0xff]  }
 0x49d   : > { %v3044_v38 = vpop.f32.mrf.mxu0  ;;  %v3449_v33 = vld [vmem:[#allocation16 + $0x1c4] ss:$16 sps:$4 sm:$0xff]  }
 0x49e   : > { %v1635_v39 = vmul.f32 0.2, %v1631_v37  ;;  %v3455_v35 = vld [vmem:[#allocation16 + $0x1a4] ss:$16 sps:$4 sm:$0xff]   ;;  %v3459_v38 = vld [vmem:[#allocation16 + $0x180] ss:$16 sps:$4 sm:$0xff]  }
 0x4a0   : > { %v1637_v41 = vmax.f32 %v1631_v37, %v1635_v39  ;;  %v3461_v37 = vld [vmem:[#allocation16 + $0x184] ss:$16 sps:$4 sm:$0xff]   ;;  %v2848_v39 = vld [vmem:[%s4393_s21] ss:$0 sm:$0xff]  ;;  %s3729_s21 = scalar_lea.vmem %s4279_s15, 1024 }
 0x4a1   : > { %p3730_p2 = scmp.ne.s32.totalorder %s4279_s15, %s3729_s21 }
 0x4a2   : > { %v1638_v42 = vpack.c.bf16 %v1637_v41, %v1636_v40 }
 0x4a3   : > { %p3731_p9 = pnand %p3730_p2, %p4397_p5 }
 0x4a4   : > { %3062 = vmatmul.mubr.bf16.vlgmr.msra.gmra.mxu1 %v1638_v42 }
 0x4a5   : > { %1982 = vmatpush1.bf16.msra.mxu1 %v3369_v46  ;;  %2013 = vmatprep.mubr.bf16.mxu1 %v3830_v13  ;;  %v3467_v13 = vld [vmem:[#allocation16 + $0x164] ss:$16 sps:$4 sm:$0xff]   ;;  %p3732_p12 = pneg %p3731_p9 }
 0x4a6   : > { %1983 = vmatprep.subr.bf16.mxu1 %v3374_v48 }
 0x4a9   : > { %1984 = vmatpush1.bf16.msra.mxu1 %v3372_v49 }
 0x4aa   : > { %1985 = vmatprep.subr.bf16.mxu1 %v3377_v50  ;;  %v3396_v50 = vld [vmem:[#allocation16 + $0xe8] ss:$16 sps:$4 sm:$0xff]  }
 0x4ad   : > { %1986 = vmatpush1.bf16.msra.mxu1 %v3375_v51 }
 0x4ae   : > { %1987 = vmatprep.subr.bf16.mxu1 %v3380_v1  ;;  %v3404_v1 = vld [vmem:[#allocation16 + $0xcc] ss:$16 sps:$4 sm:$0xff]  }
 0x4b1   : > { %1988 = vmatpush1.bf16.msra.mxu1 %v3378_v0  ;;  %v3402_v0 = vld [vmem:[#allocation16 + $0xc8] ss:$16 sps:$4 sm:$0xff]  }
 0x4b2   : > { %1989 = vmatprep.subr.bf16.mxu1 %v3383_v2  ;;  %v3410_v2 = vld [vmem:[#allocation16 + $0xac] ss:$16 sps:$4 sm:$0xff]  }
 0x4b5   : > { %1990 = vmatpush1.bf16.msra.mxu1 %v3381_v59  ;;  %v3408_v59 = vld [vmem:[#allocation16 + $0xa8] ss:$16 sps:$4 sm:$0xff]  }
 0x4b6   : > { %1991 = vmatprep.subr.bf16.mxu1 %v3386_v60  ;;  %v3452_v60 = vld [vmem:[#allocation16 + $0x1cc] ss:$16 sps:$4 sm:$0xff]  }
 0x4b9   : > { %1992 = vmatpush1.bf16.msra.mxu1 %v3384_v61  ;;  %v3450_v61 = vld [vmem:[#allocation16 + $0x1c8] ss:$16 sps:$4 sm:$0xff]  }
 0x4ba   : > { %1993 = vmatprep.subr.bf16.mxu1 %v3389_v62  ;;  %v3458_v62 = vld [vmem:[#allocation16 + $0x1ac] ss:$16 sps:$4 sm:$0xff]  }
 0x4bd   : > { %1994 = vmatpush1.bf16.msra.mxu1 %v3387_v63  ;;  %v3456_v63 = vld [vmem:[#allocation16 + $0x1a8] ss:$16 sps:$4 sm:$0xff]  }
 0x4be   : > { %1995 = vmatprep.subr.bf16.mxu1 %v3392_v6  ;;  %v3464_v6 = vld [vmem:[#allocation16 + $0x18c] ss:$16 sps:$4 sm:$0xff]  }
 0x4c1   : > { %1996 = vmatpush1.bf16.msra.mxu1 %v3390_v12  ;;  %v3462_v12 = vld [vmem:[#allocation16 + $0x188] ss:$16 sps:$4 sm:$0xff]  }
 0x4c2   : > { %2483 = vmatprep.subr.bf16.mxu1 %v3398_v16  ;;  %v3468_v16 = vld [vmem:[#allocation16 + $0x168] ss:$16 sps:$4 sm:$0xff]  }
 0x564   : > { %v1744_v7 = vpop.f32.mrf.mxu1 }
 0x565   : > { %v1745_v8 = vadd.f32 %v2839_v3, %v1744_v7  ;;  %v3414_v7 = vld [vmem:[#allocation16 + $0x88] ss:$16 sps:$4 sm:$0xff]  }
 0x566   : > { %v3063_v9 = vpop.f32.mrf.mxu1 }
 0x567   : > { %v1751_v52 = vmul.f32 0.2, %v1745_v8  ;;  %v3420_v9 = vld [vmem:[#allocation16 + $0x68] ss:$16 sps:$4 sm:$0xff]  }
 0x568   : > { %v1747_v10 = vpop.f32.mrf.mxu1 }
 0x569   : > { %v1748_v53 = vadd.f32 %v2839_v3, %v1747_v10  ;;  %v1753_v56 = vmax.f32 %v1745_v8, %v1751_v52  ;;  %v3416_v3 = vld [vmem:[#allocation16 + $0x8c] ss:$16 sps:$4 sm:$0xff]   ;;  %v3426_v52 = vld [vmem:[#allocation16 + $0x48] ss:$16 sps:$4 sm:$0xff]  }
 0x56a   : > { %v3064_v54 = vpop.f32.mrf.mxu1  ;;  %v3422_v8 = vld [vmem:[#allocation16 + $0x6c] ss:$16 sps:$4 sm:$0xff]  }
 0x56b   : > { %v1752_v55 = vmul.f32 0.2, %v1748_v53  ;;  %v3428_v10 = vld [vmem:[#allocation16 + $0x4c] ss:$16 sps:$4 sm:$0xff]   ;;  %v3432_v54 = vld [vmem:[#allocation16 + $0x28] ss:$16 sps:$4 sm:$0xff]  }
 0x56d   : > { %v1754_v57 = vmax.f32 %v1748_v53, %v1752_v55  ;;  %v3434_v53 = vld [vmem:[#allocation16 + $0x2c] ss:$16 sps:$4 sm:$0xff]  }
 0x56e   : > { %v3440_v55 = vld [vmem:[#allocation16 + $0xc] ss:$16 sps:$4 sm:$0xff]  }
 0x56f   : > { %v1755_v58 = vpack.c.bf16 %v1754_v57, %v1753_v56  ;;  %v3438_v56 = vld [vmem:[#allocation16 + $0x8] ss:$16 sps:$4 sm:$0xff]   ;;  %v3446_v57 = vld [vmem:[#allocation16 + $0x1ec] ss:$16 sps:$4 sm:$0xff]  }
 0x571   : > { %3082 = vmatmul.mubr.bf16.vlgmr.msra.gmra.mxu0 %v1755_v58  ;;  %v3444_v58 = vld [vmem:[#allocation16 + $0x1e8] ss:$16 sps:$4 sm:$0xff]  }
 0x572   : > { %2441 = vmatpush1.bf16.msra.mxu0 %v3393_v14  ;;  %v3470_v14 = vld [vmem:[#allocation16 + $0x16c] ss:$16 sps:$4 sm:$0xff]  }
 0x573   : > { %2442 = vmatprep.subr.bf16.mxu0 %v3401_v17  ;;  %v3473_v17 = vld [vmem:[#allocation16 + $0x144] ss:$16 sps:$4 sm:$0xff]  }
 0x576   : > { %2443 = vmatpush1.bf16.msra.mxu0 %v3399_v18  ;;  %v3476_v18 = vld [vmem:[#allocation16 + $0x14c] ss:$16 sps:$4 sm:$0xff]  }
 0x577   : > { %2444 = vmatprep.subr.bf16.mxu0 %v3407_v19  ;;  %v3471_v19 = vld [vmem:[#allocation16 + $0x140] ss:$16 sps:$4 sm:$0xff]  }
 0x57a   : > { %2445 = vmatpush1.bf16.msra.mxu0 %v3405_v20  ;;  %v3474_v20 = vld [vmem:[#allocation16 + $0x148] ss:$16 sps:$4 sm:$0xff]  }
 0x57b   : > { %2446 = vmatprep.subr.bf16.mxu0 %v3413_v21  ;;  %v3479_v21 = vld [vmem:[#allocation16 + $0x124] ss:$16 sps:$4 sm:$0xff]  }
 0x57e   : > { %2447 = vmatpush1.bf16.msra.mxu0 %v3411_v22  ;;  %v3482_v22 = vld [vmem:[#allocation16 + $0x12c] ss:$16 sps:$4 sm:$0xff]  }
 0x57f   : > { %2448 = vmatprep.subr.bf16.mxu0 %v3419_v23  ;;  %v3477_v23 = vld [vmem:[#allocation16 + $0x120] ss:$16 sps:$4 sm:$0xff]  }
 0x582   : > { %2449 = vmatpush1.bf16.msra.mxu0 %v3417_v24  ;;  %v3480_v24 = vld [vmem:[#allocation16 + $0x128] ss:$16 sps:$4 sm:$0xff]  }
 0x583   : > { %2450 = vmatprep.subr.bf16.mxu0 %v3425_v25  ;;  %v3485_v25 = vld [vmem:[#allocation16 + $0x104] ss:$16 sps:$4 sm:$0xff]  }
 0x586   : > { %2451 = vmatpush1.bf16.msra.mxu0 %v3423_v26  ;;  %v3488_v26 = vld [vmem:[#allocation16 + $0x10c] ss:$16 sps:$4 sm:$0xff]  }
 0x587   : > { %2452 = vmatprep.subr.bf16.mxu0 %v3431_v27  ;;  %v3483_v27 = vld [vmem:[#allocation16 + $0x100] ss:$16 sps:$4 sm:$0xff]  }
 0x58a   : > { %2453 = vmatpush1.bf16.msra.mxu0 %v3429_v28  ;;  %v3486_v28 = vld [vmem:[#allocation16 + $0x108] ss:$16 sps:$4 sm:$0xff]  }
 0x58b   : > { %2454 = vmatprep.subr.bf16.mxu0 %v3437_v29  ;;  %v1889_v29 = vld [vmem:[%s4394_s4] sm:$0x3]  ;;  %s3735_s4 = scalar_lea.vmem %s3734_s3, 2048 }
 0x58c   : > { %p3737_p3 = scmp.lt.s32.totalorder %s3735_s4, %s3729_s21 }
 0x58e   : > { %2455 = vmatpush1.bf16.msra.mxu0 %v3435_v30  ;;  %v1898_v30 = vrot.slane %v1889_v29, %v4211_v11  ;;  %p3738_p4 = por %p3737_p3, %p3736_p1 }
 0x58f   : > { %2456 = vmatprep.subr.bf16.mxu0 %v3443_v31  ;;  %v1894_v31 = vrot.slane %v1889_v29, %v4205_v5 }
 0x590   : > { %p3739_p6 = pnand %p3738_p4, %p3732_p12 }
 0x592   : > { %2457 = vmatpush2.bf16.msra.mxu0 %v3441_v32 }
 0x593   : > { %2458 = vmatprep.subr.bf16.mxu0 %v3449_v33 }
 0x596   : > { %2459 = vmatpush2.bf16.msra.mxu0 %v3447_v34 }
 0x597   : > { %2460 = vmatprep.subr.bf16.mxu0 %v3455_v35 }
 0x59a   : > { %2461 = vmatpush2.bf16.msra.mxu0 %v3453_v36 }
 0x59b   : > { %2462 = vmatprep.subr.bf16.mxu0 %v3461_v37 }
 0x59e   : > { %2463 = vmatpush2.bf16.msra.mxu0 %v3459_v38 }
 0x59f   : > { %2464 = vmatprep.subr.bf16.mxu0 %v3467_v13 }
 0x5a2   : > { %2465 = vmatpush2.bf16.msra.mxu0 %v3465_v15 }
 0x5a3   : > { %2466 = vmatprep.subr.bf16.mxu0 %v3473_v17 }
 0x5a6   : > { %2467 = vmatpush2.bf16.msra.mxu0 %v3471_v19 }
 0x5a7   : > { %2468 = vmatprep.subr.bf16.mxu0 %v3479_v21 }
 0x5aa   : > { %2469 = vmatpush2.bf16.msra.mxu0 %v3477_v23 }
 0x5ab   : > { %2470 = vmatprep.subr.bf16.mxu0 %v3485_v25 }
 0x5ae   : > { %2471 = vmatpush2.bf16.msra.mxu0 %v3483_v27 }
 0x631   : > { %v1861_v40 = vpop.f32.mrf.mxu0 }
 0x632   : > { %v1862_v41 = vadd.f32 %v2848_v39, %v1861_v40 }
 0x633   : > { %v3083_v42 = vpop.f32.mrf.mxu0 }
 0x634   : > { %v1868_v44 = vmul.f32 0.2, %v1862_v41 }
 0x635   : > { %v1864_v43 = vpop.f32.mrf.mxu0 }
 0x636   : > { %v1865_v45 = vadd.f32 %v2848_v39, %v1864_v43  ;;  %v1870_v48 = vmax.f32 %v1862_v41, %v1868_v44 }
 0x637   : > { %v3084_v46 = vpop.f32.mrf.mxu0 }
 0x638   : > { %v1869_v47 = vmul.f32 0.2, %v1865_v45 }
 0x63a   : > { %v1871_v49 = vmax.f32 %v1865_v45, %v1869_v47 }
 0x63c   : > { %v1872_v51 = vpack.c.bf16 %v1871_v49, %v1870_v48 }
 0x63e   : > { %2014 = vmatmul.mubr.bf16.vlgmr.msra.gmra.mxu1 %v1872_v51  ;;  %v2098_v51 = vld [vmem:[%s4395_s29] sm:$0xf] }
 0x63f   : > { %2484 = vmatpush1.bf16.msra.mxu1 %v3396_v50  ;;  %v2110_v50 = vsub.s32 2, %v4202_v4 }
 0x640   : > { %2485 = vmatprep.subr.bf16.mxu1 %v3404_v1  ;;  %v2114_v1 = vsub.s32 3, %v4202_v4 }
 0x643   : > { %2486 = vmatpush1.bf16.msra.mxu1 %v3402_v0  ;;  %v2103_v0 = vrot.slane %v2098_v51, %v4205_v5 }
 0x644   : > { %2487 = vmatprep.subr.bf16.mxu1 %v3410_v2  ;;  %v2111_v2 = vrot.slane %v2098_v51, %v2110_v50 }
 0x647   : > { %2488 = vmatpush1.bf16.msra.mxu1 %v3408_v59  ;;  %v2107_v59 = vrot.slane %v2098_v51, %v4211_v11 }
 0x648   : > { %2489 = vmatprep.subr.bf16.mxu1 %v3416_v3  ;;  %v2115_v3 = vrot.slane %v2098_v51, %v2114_v1 }
 0x64b   : > { %2490 = vmatpush1.bf16.msra.mxu1 %v3414_v7 }
 0x64c   : > { %2491 = vmatprep.subr.bf16.mxu1 %v3422_v8 }
 0x64f   : > { %2492 = vmatpush1.bf16.msra.mxu1 %v3420_v9 }
 0x650   : > { %2493 = vmatprep.subr.bf16.mxu1 %v3428_v10 }
 0x653   : > { %2494 = vmatpush1.bf16.msra.mxu1 %v3426_v52 }
 0x654   : > { %2495 = vmatprep.subr.bf16.mxu1 %v3434_v53 }
 0x657   : > { %2496 = vmatpush1.bf16.msra.mxu1 %v3432_v54 }
 0x658   : > { %2497 = vmatprep.subr.bf16.mxu1 %v3440_v55 }
 0x65b   : > { %2498 = vmatpush1.bf16.msra.mxu1 %v3438_v56 }
 0x65c   : > { %2499 = vmatprep.subr.bf16.mxu1 %v3446_v57 }
 0x65f   : > { %2500 = vmatpush2.bf16.msra.mxu1 %v3444_v58 }
 0x660   : > { %2501 = vmatprep.subr.bf16.mxu1 %v3452_v60 }
 0x663   : > { %2502 = vmatpush2.bf16.msra.mxu1 %v3450_v61 }
 0x664   : > { %2503 = vmatprep.subr.bf16.mxu1 %v3458_v62 }
 0x667   : > { %2504 = vmatpush2.bf16.msra.mxu1 %v3456_v63 }
 0x668   : > { %2505 = vmatprep.subr.bf16.mxu1 %v3464_v6 }
 0x66b   : > { %2506 = vmatpush2.bf16.msra.mxu1 %v3462_v12 }
 0x66c   : > { %2507 = vmatprep.subr.bf16.mxu1 %v3470_v14 }
 0x66f   : > { %2508 = vmatpush2.bf16.msra.mxu1 %v3468_v16 }
 0x670   : > { %2509 = vmatprep.subr.bf16.mxu1 %v3476_v18 }
 0x673   : > { %2510 = vmatpush2.bf16.msra.mxu1 %v3474_v20 }
 0x674   : > { %2511 = vmatprep.subr.bf16.mxu1 %v3482_v22 }
 0x677   : > { %2512 = vmatpush2.bf16.msra.mxu1 %v3480_v24 }
 0x678   : > { %2513 = vmatprep.subr.bf16.mxu1 %v3488_v26 }
 0x67b   : > { %2514 = vmatpush2.bf16.msra.mxu1 %v3486_v28 }
 0x6fe   : > { %v2015_v32 = vpop.f32.mrf.mxu1 }
 0x6ff   : > { %v2016_v35 = vadd.f32 %v2015_v32, %v1894_v31 }
 0x700   : > { %v2017_v33 = vpop.f32.mrf.mxu1 }
 0x701   : > { %v2018_v34 = vadd.f32 %v2017_v33, %v1898_v30  ;;  %v2024_v42 = vmul.f32 0.2, %v2016_v35 }
 0x702   : > { %v2019_v36 = vpop.f32.mrf.mxu1 }
 0x703   : > { %v2020_v37 = vadd.f32 %v2019_v36, %v1894_v31  ;;  %v2025_v39 = vmul.f32 0.2, %v2018_v34  ;;  %v2028_v47 = vmax.f32 %v2016_v35, %v2024_v42 }
 0x704   : > { %v2021_v38 = vpop.f32.mrf.mxu1 }
 0x705   : > { %v2026_v40 = vmul.f32 0.2, %v2020_v37  ;;  %v2022_v41 = vadd.f32 %v2021_v38, %v1898_v30  ;;  %v2029_v45 = vmax.f32 %v2018_v34, %v2025_v39 }
 0x707   : > { %v2027_v43 = vmul.f32 0.2, %v2022_v41  ;;  %v2030_v44 = vmax.f32 %v2020_v37, %v2026_v40 }
 0x709   : > { %v2031_v46 = vmax.f32 %v2022_v41, %v2027_v43  ;;  %v2032_v49 = vpack.c.bf16 %v2030_v44, %v2028_v47 }
 0x70b   : > { %v2033_v48 = vpack.c.bf16 %v2031_v46, %v2029_v45 }
 0x70d   : > { %2472 = vmatprep.mubr.bf16.mxu0 %v2033_v48  ;;  %2515 = vmatprep.mubr.bf16.mxu1 %v2033_v48 }
 0x70e   : > { %2473 = vmatmul.mubr.bf16.vlgmr.msra.gmra.mxu0 %v2032_v49  ;;  %2516 = vmatmul.mubr.bf16.vlgmr.msra.gmra.mxu1 %v2032_v49 }
 0x7ce   : > { %v2474_v7 = vpop.f32.mrf.mxu0  ;;  %v2517_v8 = vpop.f32.mrf.mxu1 }
 0x7cf   : > { %v2475_v9 = vadd.f32 %v2474_v7, %v2103_v0  ;;  %v2518_v10 = vadd.f32 %v2517_v8, %v2111_v2 }
 0x7d0   : > { %v2476_v52 = vpop.f32.mrf.mxu0  ;;  %v2519_v53 = vpop.f32.mrf.mxu1 }
 0x7d1   : > { %v2526_v54 = vmul.f32 0.2, %v2475_v9  ;;  %v2528_v55 = vmul.f32 0.2, %v2518_v10  ;;  %v2477_v56 = vadd.f32 %v2476_v52, %v2107_v59  ;;  %v2520_v57 = vadd.f32 %v2519_v53, %v2115_v3 }
 0x7d2   : > { %v2478_v58 = vpop.f32.mrf.mxu0  ;;  %v2521_v60 = vpop.f32.mrf.mxu1 }
 0x7d3   : > { %v2534_v4 = vmax.f32 %v2475_v9, %v2526_v54  ;;  %v2536_v5 = vmax.f32 %v2518_v10, %v2528_v55  ;;  %v2527_v61 = vmul.f32 0.2, %v2477_v56  ;;  %v2529_v62 = vmul.f32 0.2, %v2520_v57 }
 0x7d4   : > { %v2479_v11 = vadd.f32 %v2478_v58, %v2103_v0  ;;  %v2522_v63 = vadd.f32 %v2521_v60, %v2111_v2  ;;  %v2480_v6 = vpop.f32.mrf.mxu0  ;;  %v2523_v12 = vpop.f32.mrf.mxu1 }
 0x7d5   : > { %2542 = vst [vmem:[%s683_s18] sm:$0xff] %v2534_v4  ;;  %2544 = vst [vmem:[%s683_s18 + $0x10] sm:$0xff] %v2536_v5  ;;  %v2535_v13 = vmax.f32 %v2477_v56, %v2527_v61  ;;  %v2537_v14 = vmax.f32 %v2520_v57, %v2529_v62  ;;  %v2481_v15 = vadd.f32 %v2480_v6, %v2107_v59 }
 0x7d6   : > { %v2524_v16 = vadd.f32 %v2523_v12, %v2115_v3  ;;  %v2530_v17 = vmul.f32 0.2, %v2479_v11  ;;  %v2532_v18 = vmul.f32 0.2, %v2522_v63 }
 0x7d7   : > { %2543 = vst [vmem:[%s683_s18 + $0x8] sm:$0xff] %v2535_v13  ;;  %2545 = vst [vmem:[%s683_s18 + $0x18] sm:$0xff] %v2537_v14  ;;  %v2531_v19 = vmul.f32 0.2, %v2481_v15 }
 0x7d8   : > { %v2533_v20 = vmul.f32 0.2, %v2524_v16  ;;  %v2538_v21 = vmax.f32 %v2479_v11, %v2530_v17  ;;  %v2540_v22 = vmax.f32 %v2522_v63, %v2532_v18 }
 0x7d9   : > { %v2539_v23 = vmax.f32 %v2481_v15, %v2531_v19 }
 0x7da   : > { %v2541_v24 = vmax.f32 %v2524_v16, %v2533_v20  ;;  %2546 = vst [vmem:[%s683_s18 + $0x20] sm:$0xff] %v2538_v21  ;;  %2548 = vst [vmem:[%s683_s18 + $0x30] sm:$0xff] %v2540_v22 }
 0x7db   : > { %2547 = vst [vmem:[%s683_s18 + $0x28] sm:$0xff] %v2539_v23 }
 0x7dc   : > { %2549 = vst [vmem:[%s683_s18 + $0x38] sm:$0xff] %v2541_v24 }
 0x7dd   : > { %3742 = shalt.err (!%p3739_p6)
}
 0x7de   : > { %s3743_s5 = scalar_lea.hbm %s4284_s19, 1024  ;;  %s3747_s18 = scalar_lea.hbm %s4396_s23, 2048 }
 0x7df   : > { %p3744_p8 = scmp.ne.s32.totalorder %s4284_s19, %s3743_s5  ;;  %p3748_p11 = scmp.lt.s32.totalorder %s4284_s19, %s4396_s23 }
 0x7e0   : > { %p3749_p13 = scmp.lt.s32.totalorder %s3747_s18, %s3743_s5 }
 0x7e1   : > { %p3745_p10 = pnand %p3744_p8, %p4397_p5 }
 0x7e2   : > { %p3750_p0 = por %p3749_p13, %p3748_p11 }
 0x7e3   : > { %p3746_p7 = pneg %p3745_p10 }
 0x7e5   : > { %p3751_p2 = pnand %p3750_p0, %p3746_p7 }
 0x7e7   : > { %3754 = shalt.err (!%p3751_p2)
}
 0x7e8   : > { %s3832_s6 = smov 512   ;;  %s3833_s21 = smov 32  }
 0x7e9   : > { %3119 = dma.vmem_to_hbm [thread:$0]  (%p4397_p5), %s4279_s15, 1024, %s4284_s19, %s2551_s0, %s3832_s6, %s3832_s6, %s3833_s21  }
 0x7ea PF: > { %s2580_s2 = sand.u32 1, %s3797_s24   ;;  %p4398_p9 = scmp.ne.s32.totalorder %s4380_s28, 0 }
 0x7eb   : > { %p4399_p12 = scmp.ge.s32.totalorder %s3809_s27, 2  ;;  %s2581_s3 = scalar_lea.sflag [#allocation4], %s2580_s2 }
 0x7ed   : > { %p3151_p1 = pnand %p4399_p12, %p4398_p9 }
 0x7ef   : > { %p3152_p3 = pneg %p3151_p1 }
 0x7f1   : > { %3792 = dma.done.wait (%p3152_p3), %s2581_s3, 1024  }
 0x7f2   : > { %3794 = vsyncadd (%p3152_p3), %s2581_s3, 4294966272  ;;  %p34_p4 = scmp.ge.s32.totalorder %s4058_s1, 4   ;;  %s4400_s24 = smov %s3801_s25 }
 0x7f3   : > { %s4401_s25 = smov %s3805_s26  ;;  %s4402_s26 = smov %s4069_s16 }
 0x7f4   : > { %s4403_s27 = smov %s4058_s1  ;;  %36 = sbr.rel (!%p34_p4) target bundleno = 22 (0x16), region = 165 }
 0x7f9   :  { %2586 = vsyncpa [#allocation3], 1 }
 0x7fa   :  { %2588 = vsyncpa [#allocation3 + $0x1], 1 }
 0x7fb   :  { %2589 = vsyncpa [#allocation6], 1 }
 0x7fc   :  { %2590 = vsyncpa [#allocation9], 1 }
 0x7fd   :  { %2591 = vsyncpa [#allocation12], 1 }
 0x7fe   :  { %2592 = vsyncpa [#allocation15], 1 }
 0x7ff   :  { %2593 = vsyncpa [#allocation4], 1 }
 0x800   :  { %2595 = vsyncpa [#allocation4 + $0x1], 1 }

</bundles_post_ra>
